<compile_context>
chip_gen: v6e
topology: v6e:2x2x1
jax: 0.10.0
libtpu: 0.0.40
codegen_flags: <defaults>
</compile_context>

<pallas_src>
import jax
import jax.numpy as jnp
import numpy as np
from jax.experimental import pallas as pl
from jax.experimental.pallas import tpu as pltpu


# ----------------------------- config -----------------------------
N = 2                 # batch
C_IN = 4              # start_channel
H = W = 16            # input_image_dim
C_OUT = 2             # channels[0]
K = 4                 # convs[0]
PAD = 1               # pads[0]
H_OUT = H + 2 * PAD - K + 1   # 15
W_OUT = W + 2 * PAD - K + 1   # 15
FEAT = C_OUT * H_OUT * W_OUT  # 450
IN_FEAT = C_IN * H * W        # 1024 (already a multiple of 128)
FEAT_PAD = 512                # FEAT padded to a lane multiple (fc1 contraction)
FC1 = 10
FC2 = 10
FC_PAD = 128                  # lane-dense hidden / output width
NEG_SLOPE = 0.01              # torch.nn.LeakyReLU default


# ----------------------------- fused kernel -----------------------------
def fused_kernel(x_ref, wc_ref, w1_ref, b1_ref, w2_ref, b2_ref, out_ref):
    """conv(as matmul) -> leaky_relu -> fc1 -> leaky_relu -> fc2 -> clip.

    x_ref  : (N, IN_FEAT)        f32  flattened NCHW input
    wc_ref : (IN_FEAT, FEAT_PAD) f32  Toeplitz conv matrix (torch-flatten col order)
    w1_ref : (FEAT_PAD, FC_PAD)  f32  fc1 weight (padded, pre-transposed)
    b1_ref : (1, FC_PAD)         f32
    w2_ref : (FC_PAD, FC_PAD)    f32  fc2 weight (padded, pre-transposed)
    b2_ref : (1, FC_PAD)         f32
    out_ref: (N, FC_PAD)         f32  (first FC2 columns are the real output)
    """
    x = x_ref[...]                                                       # (N, 1024)
    conv = jnp.dot(x, wc_ref[...], preferred_element_type=jnp.float32)   # (N, 512)
    h0 = jnp.where(conv >= 0, conv, NEG_SLOPE * conv)                    # leaky_relu
    h1 = jnp.dot(h0, w1_ref[...], preferred_element_type=jnp.float32) + b1_ref[...]
    h1 = jnp.where(h1 >= 0, h1, NEG_SLOPE * h1)                          # leaky_relu
    h2 = jnp.dot(h1, w2_ref[...], preferred_element_type=jnp.float32) + b2_ref[...]
    out_ref[...] = jnp.clip(h2, -15.0, 15.0)


def _fused_pallas(x_flat, wc, w1p, b1p, w2p, b2p):
    return pl.pallas_call(
        fused_kernel,
        out_shape=jax.ShapeDtypeStruct((N, FC_PAD), jnp.float32),
        in_specs=[pl.BlockSpec(memory_space=pltpu.MemorySpace.VMEM)] * 6,
        out_specs=pl.BlockSpec(memory_space=pltpu.MemorySpace.VMEM),
    )(x_flat, wc, w1p, b1p, w2p, b2p)


# ----------------------------- forward -----------------------------
@jax.jit
def feature_extractor_forward(x, packed_params):
    """x: (N, C_IN, H, W) f32; packed_params from pack_params(). Returns (N*FC2,)."""
    wc, w1p, b1p, w2p, b2p = packed_params
    # `x * 1.0` from the torch code is a no-op: dropped.
    # Metadata-only reshape of a contiguous NCHW tensor (== torch flatten order).
    x_flat = x.reshape(x.shape[0], -1)                     # (N, 1024)
    out_pad = _fused_pallas(x_flat, wc, w1p, b1p, w2p, b2p)  # (N, 128) lane-dense
    return out_pad[:, :FC2].reshape(-1)                    # torch .flatten()


# ----------------------------- param packing (host-side, once) -----------------------------
def pack_params(params):
    """Bake all layout work into the params (one-time, zero runtime cost).

    - conv weight -> Toeplitz matrix (IN_FEAT, FEAT_PAD); columns ordered as
      torch flatten(start_dim=1) of the NCHW conv output (co*HW + oh*W_out + ow),
      zero-padding already folded in (padded taps simply have no row).
    - fc weights pre-transposed and zero-padded so every operand is lane-dense;
      zero pad rows/cols keep the padded tail numerically inert.
    """
    conv_w, w1, b1, w2, b2 = params
    cw = np.asarray(conv_w, np.float32)            # (C_OUT, C_IN, K, K)

    co, ci, kh, kw, oh, ow = np.meshgrid(
        np.arange(C_OUT), np.arange(C_IN), np.arange(K), np.arange(K),
        np.arange(H_OUT), np.arange(W_OUT), indexing="ij")
    ih = oh + kh - PAD
    iw = ow + kw - PAD
    valid = (ih >= 0) & (ih < H) & (iw >= 0) & (iw < W)
    rows = (ci * H + ih) * W + iw                  # flattened input feature idx
    cols = (co * H_OUT + oh) * W_OUT + ow          # torch flatten order of conv out
    vals = cw[co, ci, kh, kw]
    wc = np.zeros((IN_FEAT, FEAT_PAD), np.float32)
    wc[rows[valid], cols[valid]] = vals[valid]

    w1p = np.zeros((FEAT_PAD, FC_PAD), np.float32)
    w1p[:FEAT, :FC1] = np.asarray(w1, np.float32).T    # torch (out,in) -> (in,out)
    b1p = np.zeros((1, FC_PAD), np.float32)
    b1p[0, :FC1] = np.asarray(b1, np.float32)

    w2p = np.zeros((FC_PAD, FC_PAD), np.float32)
    w2p[:FC1, :FC2] = np.asarray(w2, np.float32).T
    b2p = np.zeros((1, FC_PAD), np.float32)
    b2p[0, :FC2] = np.asarray(b2, np.float32)

    return (jnp.asarray(wc), jnp.asarray(w1p), jnp.asarray(b1p),
            jnp.asarray(w2p), jnp.asarray(b2p))


# ----------------------------- params & reference -----------------------------
def init_params(key):
    k1, k2, k3 = jax.random.split(key, 3)

    def xavier(k, shape, fan_in, fan_out):
        limit = jnp.sqrt(6.0 / (fan_in + fan_out))
        return jax.random.uniform(k, shape, jnp.float32, -limit, limit)

    conv_w = xavier(k1, (C_OUT, C_IN, K, K), C_IN * K * K, C_OUT * K * K)
    w1 = xavier(k2, (FC1, FEAT), FEAT, FC1)   # torch Linear layout (out, in)
    b1 = jnp.zeros((FC1,), jnp.float32)       # init_layer fills biases with 0.0
    w2 = xavier(k3, (FC2, FC1), FC1, FC2)
    b2 = jnp.zeros((FC2,), jnp.float32)
    return conv_w, w1, b1, w2, b2


def reference_forward(x, params):
    """Pure-JAX reference mirroring the PyTorch forward (torch-layout params)."""
    conv_w, w1, b1, w2, b2 = params
    leaky = lambda v: jnp.where(v >= 0, v, NEG_SLOPE * v)
    y = jax.lax.conv_general_dilated(
        x, conv_w, window_strides=(1, 1), padding=((PAD, PAD), (PAD, PAD)),
        dimension_numbers=("NCHW", "OIHW", "NCHW"))
    y = y.reshape(x.shape[0], -1)
    y = leaky(y)
    y = leaky(y @ w1.T + b1)
    y = y @ w2.T + b2
    return jnp.clip(y, -15.0, 15.0).reshape(-1)


# ----------------------------- main -----------------------------
if __name__ == "__main__":
    key = jax.random.PRNGKey(0)
    kx, kp = jax.random.split(key)
    x = jax.random.normal(kx, (N, C_IN, H, W), jnp.float32)
    params = init_params(kp)
    packed = pack_params(params)

    out = feature_extractor_forward(x, packed)
    out = jax.block_until_ready(out)

    ref = reference_forward(x, params)
    assert out.shape == (N * FC2,), out.shape
    assert jnp.allclose(out, ref, atol=1e-4, rtol=1e-4), (out, ref)

    print("KERNEL_OK")
</pallas_src>

<mosaic_0001>
module attributes {stable_mosaic.version = 11 : i64} {
  func.func @fused_kernel(%arg0: memref<2x1024xf32, #tpu.memory_space<vmem>>, %arg1: memref<1024x512xf32, #tpu.memory_space<vmem>>, %arg2: memref<512x128xf32, #tpu.memory_space<vmem>>, %arg3: memref<1x128xf32, #tpu.memory_space<vmem>>, %arg4: memref<128x128xf32, #tpu.memory_space<vmem>>, %arg5: memref<1x128xf32, #tpu.memory_space<vmem>>, %arg6: memref<2x128xf32, #tpu.memory_space<vmem>>) attributes {dimension_semantics = [], scalar_prefetch = 0 : i64, scratch_operands = 0 : i64, tpu.core_type = #tpu.core_type<tc>} {
    %c0 = arith.constant 0 : index
    %c0_0 = arith.constant 0 : index
    %0 = vector.load %arg0[%c0, %c0_0] : memref<2x1024xf32, #tpu.memory_space<vmem>>, vector<2x1024xf32>
    %c0_1 = arith.constant 0 : index
    %c0_2 = arith.constant 0 : index
    %1 = vector.load %arg1[%c0_1, %c0_2] : memref<1024x512xf32, #tpu.memory_space<vmem>>, vector<1024x512xf32>
    %cst = arith.constant dense<0.000000e+00> : vector<2x512xf32>
    %2 = tpu.matmul %0, %1, %cst {dimension_numbers = #tpu.dot_dimension_numbers<[1], [0], [0], [1], [0, 0, 1, 1], [], []>} : vector<2x1024xf32>, vector<1024x512xf32>, vector<2x512xf32> -> vector<2x512xf32>
    %cst_3 = arith.constant 0.000000e+00 : f32
    %3 = vector.broadcast %cst_3 : f32 to vector<2x512xf32>
    %4 = arith.cmpf oge, %2, %3 : vector<2x512xf32>
    %cst_4 = arith.constant 0.00999999977 : f32
    %5 = vector.broadcast %cst_4 : f32 to vector<2x512xf32>
    %6 = arith.mulf %5, %2 : vector<2x512xf32>
    %7 = arith.select %4, %2, %6 : vector<2x512xi1>, vector<2x512xf32>
    %c0_5 = arith.constant 0 : index
    %c0_6 = arith.constant 0 : index
    %8 = vector.load %arg2[%c0_5, %c0_6] : memref<512x128xf32, #tpu.memory_space<vmem>>, vector<512x128xf32>
    %cst_7 = arith.constant dense<0.000000e+00> : vector<2x128xf32>
    %9 = tpu.matmul %7, %8, %cst_7 {dimension_numbers = #tpu.dot_dimension_numbers<[1], [0], [0], [1], [0, 0, 1, 1], [], []>} : vector<2x512xf32>, vector<512x128xf32>, vector<2x128xf32> -> vector<2x128xf32>
    %c0_8 = arith.constant 0 : index
    %c0_9 = arith.constant 0 : index
    %10 = vector.load %arg3[%c0_8, %c0_9] : memref<1x128xf32, #tpu.memory_space<vmem>>, vector<1x128xf32>
    %11 = vector.broadcast %10 : vector<1x128xf32> to vector<2x128xf32>
    %12 = arith.addf %9, %11 : vector<2x128xf32>
    %cst_10 = arith.constant 0.000000e+00 : f32
    %13 = vector.broadcast %cst_10 : f32 to vector<2x128xf32>
    %14 = arith.cmpf oge, %12, %13 : vector<2x128xf32>
    %cst_11 = arith.constant 0.00999999977 : f32
    %15 = vector.broadcast %cst_11 : f32 to vector<2x128xf32>
    %16 = arith.mulf %15, %12 : vector<2x128xf32>
    %17 = arith.select %14, %12, %16 : vector<2x128xi1>, vector<2x128xf32>
    %c0_12 = arith.constant 0 : index
    %c0_13 = arith.constant 0 : index
    %18 = vector.load %arg4[%c0_12, %c0_13] : memref<128x128xf32, #tpu.memory_space<vmem>>, vector<128x128xf32>
    %cst_14 = arith.constant dense<0.000000e+00> : vector<2x128xf32>
    %19 = tpu.matmul %17, %18, %cst_14 {dimension_numbers = #tpu.dot_dimension_numbers<[1], [0], [0], [1], [0, 0, 1, 1], [], []>} : vector<2x128xf32>, vector<128x128xf32>, vector<2x128xf32> -> vector<2x128xf32>
    %c0_15 = arith.constant 0 : index
    %c0_16 = arith.constant 0 : index
    %20 = vector.load %arg5[%c0_15, %c0_16] : memref<1x128xf32, #tpu.memory_space<vmem>>, vector<1x128xf32>
    %21 = vector.broadcast %20 : vector<1x128xf32> to vector<2x128xf32>
    %22 = arith.addf %19, %21 : vector<2x128xf32>
    %cst_17 = arith.constant -1.500000e+01 : f32
    %cst_18 = arith.constant 1.500000e+01 : f32
    %23 = vector.broadcast %cst_17 : f32 to vector<2x128xf32>
    %24 = arith.maximumf %23, %22 : vector<2x128xf32>
    %25 = vector.broadcast %cst_18 : f32 to vector<2x128xf32>
    %26 = arith.minimumf %25, %24 : vector<2x128xf32>
    %c0_19 = arith.constant 0 : index
    %c0_20 = arith.constant 0 : index
    %27 = vector.load %arg6[%c0_19, %c0_20] : memref<2x128xf32, #tpu.memory_space<vmem>>, vector<2x128xf32>
    tpu.vector_store %arg6[%c0_19, %c0_20], %26 {strides = array<i32>} : memref<2x128xf32, #tpu.memory_space<vmem>>, vector<2x128xf32>,
    return
  }
}

</mosaic_0001>

<bundles_post_ra>
// kernel: feature_extractor_forward.1
= control target key start
LH: loop header
LB: loop body
LE: loop exit
PB: predicated region body
PF: predicated region fallthrough
CT: control target
= control target key end

     0   :  { %11 = vsyncpa [#allocation3], 0  ;;  %s1921_s0 = inlined_call_operand.vmem [shape: f32[2,1024], index: 0, kind: input, shape index: {}]   ;;  %s1922_s1 = inlined_call_operand.hbm [shape: f32[1024,512], index: 1, kind: input, shape index: {}]   ;;  %s1923_s2 = inlined_call_operand.hbm [shape: f32[512,128], index: 2, kind: input, shape index: {}]   ;;  %s1924_s3 = inlined_call_operand.hbm [shape: f32[1,128], index: 3, kind: input, shape index: {}]   ;;  %s1925_s4 = inlined_call_operand.hbm [shape: f32[128,128], index: 4, kind: input, shape index: {}]   ;;  %s1926_s5 = inlined_call_operand.hbm [shape: f32[1,128], index: 5, kind: input, shape index: {}]   ;;  %s1927_s6 = inlined_call_operand.vmem [shape: f32[2,128], index: 6, kind: output, shape index: {}]  }
   0x1   :  { %12 = vsyncpa [#allocation5], 0 }
   0x2   :  { %13 = vsyncpa [#allocation8], 0  ;;  %s1787_s21 = smov [#allocation4]  }
   0x3   :  { %s33_s22 = sshll.u32 %s1787_s21, 4  ;;  %s34_s22 = int_to_ptr.vmem [resolvable:$true] %s33_s22 }
   0x4   :  { %s1689_s23 = scalar_lea.vmem %s34_s22, 8192  ;;  %p1694_p1 = scmp.lt.s32.totalorder %s34_s22, %s34_s22 }
   0x5   :  { %p1690_p0 = scmp.ne.s32.totalorder %s34_s22, %s1689_s23  ;;  %p1695_p2 = scmp.lt.s32.totalorder %s1689_s23, %s1689_s23 }
   0x7   :  { %p1696_p3 = por %p1695_p2, %p1694_p1 }
   0x9   :  { %p1697_p4 = pnand %p1696_p3, %p1690_p0 }
   0xb   :  { %1700 = shalt.err (!%p1697_p4)
}
   0xc   :  { %s1788_s24 = smov 128   ;;  %s1789_s25 = smov 8  }
   0xd   :  { %39 = dma.hbm_to_vmem [thread:$0]  %s1923_s2, 8192, %s34_s22, [#allocation5], %s1788_s24, %s1788_s24, %s1789_s25  }
   0xe   :  { %s1790_s28 = smov [#allocation7]   ;;  %s1791_s30 = smov [#allocation2]  }
   0xf   :  { %s55_s29 = sshll.u32 %s1790_s28, 4  ;;  %s21_s7 = sshll.u32 %s1791_s30, 4  ;;  %s56_s29 = int_to_ptr.vmem [resolvable:$true] %s55_s29  ;;  %s22_s7 = int_to_ptr.vmem [resolvable:$true] %s21_s7 }
  0x10   :  { %s1709_s8 = scalar_lea.vmem %s56_s29, 2048  ;;  %p1714_p6 = scmp.lt.s32.totalorder %s56_s29, %s56_s29 }
  0x11   :  { %p1710_p5 = scmp.ne.s32.totalorder %s56_s29, %s1709_s8  ;;  %p1715_p7 = scmp.lt.s32.totalorder %s1709_s8, %s1709_s8 }
  0x13   :  { %p1716_p8 = por %p1715_p7, %p1714_p6 }
  0x15   :  { %p1717_p9 = pnand %p1716_p8, %p1710_p5 }
  0x17   :  { %1720 = shalt.err (!%p1717_p9)
}
  0x18   :  { %61 = dma.hbm_to_vmem [thread:$0]  %s1925_s4, 2048, %s56_s29, [#allocation8], %s1788_s24, %s1788_s24, %s1789_s25  }
  0x19   :  { %s1729_s11 = scalar_lea.vmem %s22_s7, 65536  ;;  %p1734_p11 = scmp.lt.s32.totalorder %s22_s7, %s22_s7 }
  0x1a   :  { %p1730_p10 = scmp.ne.s32.totalorder %s22_s7, %s1729_s11  ;;  %p1735_p12 = scmp.lt.s32.totalorder %s1729_s11, %s1729_s11 }
  0x1c   :  { %p1736_p13 = por %p1735_p12, %p1734_p11 }
  0x1e   :  { %p1737_p0 = pnand %p1736_p13, %p1730_p10 }
  0x20   :  { %1740 = shalt.err (!%p1737_p0)
}
  0x21   :  { %s1792_s2 = smov 512   ;;  %s1793_s12 = smov 32  }
  0x22   :  { %27 = dma.hbm_to_vmem [thread:$0]  %s1922_s1, 65536, %s22_s7, [#allocation3], %s1792_s2, %s1792_s2, %s1793_s12  }
  0x23   :  { %s1794_s15 = smov [#allocation6]   ;;  %s1795_s17 = smov [#allocation9]  }
  0x24   :  { %s46_s16 = sshll.u32 %s1794_s15, 4  ;;  %s68_s18 = sshll.u32 %s1795_s17, 4  ;;  %s47_s16 = int_to_ptr.vmem [resolvable:$true] %s46_s16  ;;  %s69_s18 = int_to_ptr.vmem [resolvable:$true] %s68_s18 }
  0x25   :  { %s1749_s4 = scalar_lea.vmem %s47_s16, 16  ;;  %s1753_s19 = scalar_lea.vmem %s47_s16, 32 }
  0x26   :  { %p1750_p1 = scmp.ne.s32.totalorder %s47_s16, %s1749_s4  ;;  %p1754_p2 = scmp.lt.s32.totalorder %s47_s16, %s47_s16 }
  0x27   :  { %p1755_p3 = scmp.lt.s32.totalorder %s1753_s19, %s1749_s4 }
  0x29   :  { %p1756_p4 = por %p1755_p3, %p1754_p2 }
  0x2b   :  { %p1757_p5 = pnand %p1756_p4, %p1750_p1 }
  0x2d   :  { %1760 = shalt.err (!%p1757_p5)
}
  0x2e   :  { %49 = dma.hbm_to_vmem [thread:$0]  %s1924_s3, 16, %s47_s16, [#allocation5]  }
  0x2f   :  { %s1769_s22 = scalar_lea.vmem %s69_s18, 16  ;;  %s1773_s1 = scalar_lea.vmem %s69_s18, 32 }
  0x30   :  { %p1770_p6 = scmp.ne.s32.totalorder %s69_s18, %s1769_s22  ;;  %p1774_p7 = scmp.lt.s32.totalorder %s69_s18, %s69_s18 }
  0x31   :  { %p1775_p8 = scmp.lt.s32.totalorder %s1773_s1, %s1769_s22 }
  0x33   :  { %p1776_p9 = por %p1775_p8, %p1774_p7 }
  0x35   :  { %p1777_p10 = pnand %p1776_p9, %p1770_p6 }
  0x37   :  { %1780 = shalt.err (!%p1777_p10)
}
  0x38   :  { %71 = dma.hbm_to_vmem [thread:$0]  %s1926_s5, 16, %s69_s18, [#allocation8]  }
  0x39   :  { %1781 = dma.done.wait [#allocation3], 65536  }
  0x3a   :  { %1782 = vsyncadd [#allocation3], 4294901760 }
  0x3b   :  { %1783 = dma.done.wait [#allocation5], 8208  }
  0x3c   :  { %1784 = vsyncadd [#allocation5], 4294959088 }
  0x3d   :  { %1785 = dma.done.wait [#allocation8], 2064  }
  0x3e   :  { %1786 = vsyncadd [#allocation8], 4294965232  ;;  %v150_v0 = vld [vmem:[#allocation2 + $0x1e8] sm:$0xff]  ;;  %v149_v2 = vld [vmem:[#allocation2 + $0x1e0] sm:$0xff]  ;;  %vm1798_vm4 = vmmov 0  }
  0x3f   :  { %v278_v1 = vld [vmem:[#allocation2 + $0x5e8] sm:$0xff]  ;;  %645 = vmatprep.subr.mxu0 %v150_v0  ;;  %v277_v3 = vld [vmem:[#allocation2 + $0x5e0] sm:$0xff] }
  0x40   :  { %716 = vmatprep.subr.mxu1 %v278_v1  ;;  %v146_v4 = vld [vmem:[#allocation2 + $0x1c8] sm:$0xff]  ;;  %646 = vmatpush1.msra.mxu0 %v149_v2  ;;  %v145_v6 = vld [vmem:[#allocation2 + $0x1c0] sm:$0xff] }
  0x41   :  { %v274_v5 = vld [vmem:[#allocation2 + $0x5c8] sm:$0xff]  ;;  %717 = vmatpush1.msra.mxu1 %v277_v3  ;;  %v273_v7 = vld [vmem:[#allocation2 + $0x5c0] sm:$0xff]  ;;  %647 = vmatprep.subr.mxu0 %v146_v4 }
  0x42   :  { %v142_v8 = vld [vmem:[#allocation2 + $0x1a8] sm:$0xff]  ;;  %718 = vmatprep.subr.mxu1 %v274_v5  ;;  %v141_v10 = vld [vmem:[#allocation2 + $0x1a0] sm:$0xff]  ;;  %648 = vmatpush1.msra.mxu0 %v145_v6 }
  0x43   :  { %v270_v9 = vld [vmem:[#allocation2 + $0x5a8] sm:$0xff]  ;;  %v269_v11 = vld [vmem:[#allocation2 + $0x5a0] sm:$0xff]  ;;  %719 = vmatpush1.msra.mxu1 %v273_v7  ;;  %649 = vmatprep.subr.mxu0 %v142_v8 }
  0x44   :  { %v138_v12 = vld [vmem:[#allocation2 + $0x188] sm:$0xff]  ;;  %720 = vmatprep.subr.mxu1 %v270_v9  ;;  %v137_v14 = vld [vmem:[#allocation2 + $0x180] sm:$0xff]  ;;  %650 = vmatpush1.msra.mxu0 %v141_v10 }
  0x45   :  { %v266_v13 = vld [vmem:[#allocation2 + $0x588] sm:$0xff]  ;;  %v265_v15 = vld [vmem:[#allocation2 + $0x580] sm:$0xff]  ;;  %721 = vmatpush1.msra.mxu1 %v269_v11  ;;  %651 = vmatprep.subr.mxu0 %v138_v12 }
  0x46   :  { %v134_v16 = vld [vmem:[#allocation2 + $0x168] sm:$0xff]  ;;  %722 = vmatprep.subr.mxu1 %v266_v13  ;;  %v133_v18 = vld [vmem:[#allocation2 + $0x160] sm:$0xff]  ;;  %652 = vmatpush1.msra.mxu0 %v137_v14 }
  0x47   :  { %v262_v17 = vld [vmem:[#allocation2 + $0x568] sm:$0xff]  ;;  %v261_v19 = vld [vmem:[#allocation2 + $0x560] sm:$0xff]  ;;  %723 = vmatpush1.msra.mxu1 %v265_v15  ;;  %653 = vmatprep.subr.mxu0 %v134_v16 }
  0x48   :  { %v130_v20 = vld [vmem:[#allocation2 + $0x148] sm:$0xff]  ;;  %724 = vmatprep.subr.mxu1 %v262_v17  ;;  %v129_v22 = vld [vmem:[#allocation2 + $0x140] sm:$0xff]  ;;  %654 = vmatpush1.msra.mxu0 %v133_v18 }
  0x49   :  { %v258_v21 = vld [vmem:[#allocation2 + $0x548] sm:$0xff]  ;;  %v257_v23 = vld [vmem:[#allocation2 + $0x540] sm:$0xff]  ;;  %725 = vmatpush1.msra.mxu1 %v261_v19  ;;  %655 = vmatprep.subr.mxu0 %v130_v20 }
  0x4a   :  { %v126_v24 = vld [vmem:[#allocation2 + $0x128] sm:$0xff]  ;;  %726 = vmatprep.subr.mxu1 %v258_v21  ;;  %v125_v26 = vld [vmem:[#allocation2 + $0x120] sm:$0xff]  ;;  %656 = vmatpush1.msra.mxu0 %v129_v22 }
  0x4b   :  { %v254_v25 = vld [vmem:[#allocation2 + $0x528] sm:$0xff]  ;;  %v253_v27 = vld [vmem:[#allocation2 + $0x520] sm:$0xff]  ;;  %727 = vmatpush1.msra.mxu1 %v257_v23  ;;  %657 = vmatprep.subr.mxu0 %v126_v24 }
  0x4c   :  { %v122_v28 = vld [vmem:[#allocation2 + $0x108] sm:$0xff]  ;;  %728 = vmatprep.subr.mxu1 %v254_v25  ;;  %v121_v30 = vld [vmem:[#allocation2 + $0x100] sm:$0xff]  ;;  %658 = vmatpush1.msra.mxu0 %v125_v26 }
  0x4d   :  { %v250_v29 = vld [vmem:[#allocation2 + $0x508] sm:$0xff]  ;;  %v249_v31 = vld [vmem:[#allocation2 + $0x500] sm:$0xff]  ;;  %729 = vmatpush1.msra.mxu1 %v253_v27  ;;  %659 = vmatprep.subr.mxu0 %v122_v28 }
  0x4e   :  { %v118_v32 = vld [vmem:[#allocation2 + $0xe8] sm:$0xff]  ;;  %730 = vmatprep.subr.mxu1 %v250_v29  ;;  %v117_v34 = vld [vmem:[#allocation2 + $0xe0] sm:$0xff]  ;;  %660 = vmatpush1.msra.mxu0 %v121_v30  ;;  %v1796_v30 = vmov 1983009808  }
  0x4f   :  { %v246_v33 = vld [vmem:[#allocation2 + $0x4e8] sm:$0xff]  ;;  %v245_v35 = vld [vmem:[#allocation2 + $0x4e0] sm:$0xff]  ;;  %731 = vmatpush1.msra.mxu1 %v249_v31  ;;  %661 = vmatprep.subr.mxu0 %v118_v32  ;;  %v605_v31 = vunpack.c.l.s4 %v1796_v30  ;;  %v607_v32 = vlaneseq }
  0x50   :  { %v114_v36 = vld [vmem:[#allocation2 + $0xc8] sm:$0xff]  ;;  %732 = vmatprep.subr.mxu1 %v246_v33  ;;  %v113_v38 = vld [vmem:[#allocation2 + $0xc0] sm:$0xff]  ;;  %662 = vmatpush1.msra.mxu0 %v117_v34 }
  0x51   :  { %v242_v37 = vld [vmem:[#allocation2 + $0x4c8] sm:$0xff]  ;;  %v241_v39 = vld [vmem:[#allocation2 + $0x4c0] sm:$0xff]  ;;  %733 = vmatpush1.msra.mxu1 %v245_v35  ;;  %663 = vmatprep.subr.mxu0 %v114_v36 }
  0x52   :  { %v110_v40 = vld [vmem:[#allocation2 + $0xa8] sm:$0xff]  ;;  %734 = vmatprep.subr.mxu1 %v242_v37  ;;  %v109_v42 = vld [vmem:[#allocation2 + $0xa0] sm:$0xff]  ;;  %664 = vmatpush1.msra.mxu0 %v113_v38 }
  0x53   :  { %v238_v41 = vld [vmem:[#allocation2 + $0x4a8] sm:$0xff]  ;;  %v237_v43 = vld [vmem:[#allocation2 + $0x4a0] sm:$0xff]  ;;  %735 = vmatpush1.msra.mxu1 %v241_v39  ;;  %665 = vmatprep.subr.mxu0 %v110_v40 }
  0x54   :  { %v106_v44 = vld [vmem:[#allocation2 + $0x88] sm:$0xff]  ;;  %736 = vmatprep.subr.mxu1 %v238_v41  ;;  %v105_v46 = vld [vmem:[#allocation2 + $0x80] sm:$0xff]  ;;  %666 = vmatpush1.msra.mxu0 %v109_v42  ;;  %v606_v41 = vunpack.c.0.s8 %v605_v31  ;;  %v608_v42 = vshrl.u32 %v607_v32, 7 }
  0x55   :  { %v234_v45 = vld [vmem:[#allocation2 + $0x488] sm:$0xff]  ;;  %v233_v47 = vld [vmem:[#allocation2 + $0x480] sm:$0xff]  ;;  %737 = vmatpush1.msra.mxu1 %v237_v43  ;;  %667 = vmatprep.subr.mxu0 %v106_v44 }
  0x56   :  { %v102_v48 = vld [vmem:[#allocation2 + $0x68] sm:$0xff]  ;;  %738 = vmatprep.subr.mxu1 %v234_v45  ;;  %v101_v50 = vld [vmem:[#allocation2 + $0x60] sm:$0xff]  ;;  %668 = vmatpush1.msra.mxu0 %v105_v46 }
  0x57   :  { %v230_v49 = vld [vmem:[#allocation2 + $0x468] sm:$0xff]  ;;  %v229_v51 = vld [vmem:[#allocation2 + $0x460] sm:$0xff]  ;;  %739 = vmatpush1.msra.mxu1 %v233_v47  ;;  %669 = vmatprep.subr.mxu0 %v102_v48 }
  0x58   :  { %v98_v52 = vld [vmem:[#allocation2 + $0x48] sm:$0xff]  ;;  %740 = vmatprep.subr.mxu1 %v230_v49  ;;  %v97_v54 = vld [vmem:[#allocation2 + $0x40] sm:$0xff]  ;;  %670 = vmatpush1.msra.mxu0 %v101_v50 }
  0x59   :  { %v226_v53 = vld [vmem:[#allocation2 + $0x448] sm:$0xff]  ;;  %v225_v55 = vld [vmem:[#allocation2 + $0x440] sm:$0xff]  ;;  %741 = vmatpush1.msra.mxu1 %v229_v51  ;;  %671 = vmatprep.subr.mxu0 %v98_v52  ;;  %v1852_v52 = vsub.s32 %v606_v41, %v608_v42 }
  0x5a   :  { %v94_v56 = vld [vmem:[#allocation2 + $0x28] sm:$0xff]  ;;  %742 = vmatprep.subr.mxu1 %v226_v53  ;;  %v93_v58 = vld [vmem:[#allocation2 + $0x20] sm:$0xff]  ;;  %672 = vmatpush1.msra.mxu0 %v97_v54 }
  0x5b   :  { %v222_v57 = vld [vmem:[#allocation2 + $0x428] sm:$0xff]  ;;  %v221_v59 = vld [vmem:[#allocation2 + $0x420] sm:$0xff]  ;;  %743 = vmatpush1.msra.mxu1 %v225_v55  ;;  %673 = vmatprep.subr.mxu0 %v94_v56 }
  0x5c   :  { %v90_v60 = vld [vmem:[#allocation2 + $0x8] sm:$0xff]  ;;  %744 = vmatprep.subr.mxu1 %v222_v57  ;;  %v89_v62 = vld [vmem:[#allocation2] sm:$0xff]  ;;  %674 = vmatpush1.msra.mxu0 %v93_v58 }
  0x5d   :  { %v218_v61 = vld [vmem:[#allocation2 + $0x408] sm:$0xff]  ;;  %v217_v63 = vld [vmem:[#allocation2 + $0x400] sm:$0xff]  ;;  %745 = vmatpush1.msra.mxu1 %v221_v59  ;;  %675 = vmatprep.subr.mxu0 %v90_v60 }
  0x5e   :  { %v214_v0 = vld [vmem:[#allocation2 + $0x3e8] sm:$0xff]  ;;  %746 = vmatprep.subr.mxu1 %v218_v61  ;;  %v213_v2 = vld [vmem:[#allocation2 + $0x3e0] sm:$0xff]  ;;  %676 = vmatpush1.msra.mxu0 %v89_v62 }
  0x5f   :  { %v342_v1 = vld [vmem:[#allocation2 + $0x7e8] sm:$0xff]  ;;  %v341_v3 = vld [vmem:[#allocation2 + $0x7e0] sm:$0xff]  ;;  %747 = vmatpush1.msra.mxu1 %v217_v63  ;;  %677 = vmatprep.subr.mxu0 %v214_v0 }
  0x60   :  { %v210_v4 = vld [vmem:[#allocation2 + $0x3c8] sm:$0xff]  ;;  %748 = vmatprep.subr.mxu1 %v342_v1  ;;  %v209_v6 = vld [vmem:[#allocation2 + $0x3c0] sm:$0xff]  ;;  %678 = vmatpush2.msra.mxu0 %v213_v2 }
  0x61   :  { %v338_v5 = vld [vmem:[#allocation2 + $0x7c8] sm:$0xff]  ;;  %v337_v7 = vld [vmem:[#allocation2 + $0x7c0] sm:$0xff]  ;;  %749 = vmatpush2.msra.mxu1 %v341_v3  ;;  %679 = vmatprep.subr.mxu0 %v210_v4 }
  0x62   :  { %v206_v8 = vld [vmem:[#allocation2 + $0x3a8] sm:$0xff]  ;;  %750 = vmatprep.subr.mxu1 %v338_v5  ;;  %v205_v10 = vld [vmem:[#allocation2 + $0x3a0] sm:$0xff]  ;;  %680 = vmatpush2.msra.mxu0 %v209_v6 }
  0x63   :  { %v334_v9 = vld [vmem:[#allocation2 + $0x7a8] sm:$0xff]  ;;  %v333_v11 = vld [vmem:[#allocation2 + $0x7a0] sm:$0xff]  ;;  %751 = vmatpush2.msra.mxu1 %v337_v7  ;;  %681 = vmatprep.subr.mxu0 %v206_v8 }
  0x64   :  { %v202_v12 = vld [vmem:[#allocation2 + $0x388] sm:$0xff]  ;;  %752 = vmatprep.subr.mxu1 %v334_v9  ;;  %v201_v14 = vld [vmem:[#allocation2 + $0x380] sm:$0xff]  ;;  %682 = vmatpush2.msra.mxu0 %v205_v10 }
  0x65   :  { %v330_v13 = vld [vmem:[#allocation2 + $0x788] sm:$0xff]  ;;  %v329_v15 = vld [vmem:[#allocation2 + $0x780] sm:$0xff]  ;;  %753 = vmatpush2.msra.mxu1 %v333_v11  ;;  %683 = vmatprep.subr.mxu0 %v202_v12 }
  0x66   :  { %v198_v16 = vld [vmem:[#allocation2 + $0x368] sm:$0xff]  ;;  %754 = vmatprep.subr.mxu1 %v330_v13  ;;  %v197_v18 = vld [vmem:[#allocation2 + $0x360] sm:$0xff]  ;;  %684 = vmatpush2.msra.mxu0 %v201_v14 }
  0x67   :  { %v326_v17 = vld [vmem:[#allocation2 + $0x768] sm:$0xff]  ;;  %v325_v19 = vld [vmem:[#allocation2 + $0x760] sm:$0xff]  ;;  %755 = vmatpush2.msra.mxu1 %v329_v15  ;;  %685 = vmatprep.subr.mxu0 %v198_v16 }
  0x68   :  { %v194_v20 = vld [vmem:[#allocation2 + $0x348] sm:$0xff]  ;;  %756 = vmatprep.subr.mxu1 %v326_v17  ;;  %v193_v22 = vld [vmem:[#allocation2 + $0x340] sm:$0xff]  ;;  %686 = vmatpush2.msra.mxu0 %v197_v18 }
  0x69   :  { %v322_v21 = vld [vmem:[#allocation2 + $0x748] sm:$0xff]  ;;  %v321_v23 = vld [vmem:[#allocation2 + $0x740] sm:$0xff]  ;;  %757 = vmatpush2.msra.mxu1 %v325_v19  ;;  %687 = vmatprep.subr.mxu0 %v194_v20 }
  0x6a   :  { %v190_v24 = vld [vmem:[#allocation2 + $0x328] sm:$0xff]  ;;  %758 = vmatprep.subr.mxu1 %v322_v21  ;;  %v189_v26 = vld [vmem:[#allocation2 + $0x320] sm:$0xff]  ;;  %688 = vmatpush2.msra.mxu0 %v193_v22 }
  0x6b   :  { %v318_v25 = vld [vmem:[#allocation2 + $0x728] sm:$0xff]  ;;  %v317_v27 = vld [vmem:[#allocation2 + $0x720] sm:$0xff]  ;;  %759 = vmatpush2.msra.mxu1 %v321_v23  ;;  %689 = vmatprep.subr.mxu0 %v190_v24 }
  0x6c   :  { %v186_v28 = vld [vmem:[#allocation2 + $0x308] sm:$0xff]  ;;  %760 = vmatprep.subr.mxu1 %v318_v25  ;;  %v185_v33 = vld [vmem:[#allocation2 + $0x300] sm:$0xff]  ;;  %690 = vmatpush2.msra.mxu0 %v189_v26 }
  0x6d   :  { %v314_v29 = vld [vmem:[#allocation2 + $0x708] sm:$0xff]  ;;  %v313_v34 = vld [vmem:[#allocation2 + $0x700] sm:$0xff]  ;;  %761 = vmatpush2.msra.mxu1 %v317_v27  ;;  %691 = vmatprep.subr.mxu0 %v186_v28 }
  0x6e   :  { %v182_v35 = vld [vmem:[#allocation2 + $0x2e8] sm:$0xff]  ;;  %762 = vmatprep.subr.mxu1 %v314_v29  ;;  %v181_v37 = vld [vmem:[#allocation2 + $0x2e0] sm:$0xff]  ;;  %692 = vmatpush2.msra.mxu0 %v185_v33 }
  0x6f   :  { %v310_v36 = vld [vmem:[#allocation2 + $0x6e8] sm:$0xff]  ;;  %v309_v38 = vld [vmem:[#allocation2 + $0x6e0] sm:$0xff]  ;;  %763 = vmatpush2.msra.mxu1 %v313_v34  ;;  %693 = vmatprep.subr.mxu0 %v182_v35 }
  0x70   :  { %v178_v39 = vld [vmem:[#allocation2 + $0x2c8] sm:$0xff]  ;;  %764 = vmatprep.subr.mxu1 %v310_v36  ;;  %v177_v43 = vld [vmem:[#allocation2 + $0x2c0] sm:$0xff]  ;;  %694 = vmatpush2.msra.mxu0 %v181_v37 }
  0x71   :  { %v306_v40 = vld [vmem:[#allocation2 + $0x6c8] sm:$0xff]  ;;  %v305_v44 = vld [vmem:[#allocation2 + $0x6c0] sm:$0xff]  ;;  %765 = vmatpush2.msra.mxu1 %v309_v38  ;;  %695 = vmatprep.subr.mxu0 %v178_v39 }
  0x72   :  { %v174_v45 = vld [vmem:[#allocation2 + $0x2a8] sm:$0xff]  ;;  %v87_v47 = vld [vmem:[%s1921_s0] sm:$0xff]  ;;  %766 = vmatprep.subr.mxu1 %v306_v40  ;;  %696 = vmatpush2.msra.mxu0 %v177_v43 }
  0x73   :  { %v302_v46 = vld [vmem:[#allocation2 + $0x6a8] sm:$0xff]  ;;  %v173_v48 = vld [vmem:[#allocation2 + $0x2a0] sm:$0xff]  ;;  %767 = vmatpush2.msra.mxu1 %v305_v44  ;;  %697 = vmatprep.subr.mxu0 %v174_v45  ;;  %v603_v55 = vcombine.high %v87_v47, %v87_v47  ;;  %v1855_v62 = vrot.slane %v87_v47, %v1852_v52 }
  0x74   :  { %v301_v49 = vld [vmem:[#allocation2 + $0x6a0] sm:$0xff]  ;;  %v170_v50 = vld [vmem:[#allocation2 + $0x288] sm:$0xff]  ;;  %768 = vmatprep.subr.mxu1 %v302_v46  ;;  %698 = vmatpush2.msra.mxu0 %v173_v48 }
  0x75   :  { %v298_v51 = vld [vmem:[#allocation2 + $0x688] sm:$0xff]  ;;  %v169_v53 = vld [vmem:[#allocation2 + $0x280] sm:$0xff]  ;;  %769 = vmatpush2.msra.mxu1 %v301_v49  ;;  %699 = vmatprep.subr.mxu0 %v170_v50  ;;  %v1858_v1 = vrot.slane %v603_v55, %v1852_v52  ;;  %v1862_v8 = vcombine.high %v1855_v62, %v1855_v62 }
  0x76   :  { %v297_v54 = vld [vmem:[#allocation2 + $0x680] sm:$0xff]  ;;  %v166_v56 = vld [vmem:[#allocation2 + $0x268] sm:$0xff]  ;;  %770 = vmatprep.subr.mxu1 %v298_v51  ;;  %700 = vmatpush2.msra.mxu0 %v169_v53 }
  0x77   :  { %v294_v57 = vld [vmem:[#allocation2 + $0x668] sm:$0xff]  ;;  %v165_v58 = vld [vmem:[#allocation2 + $0x260] sm:$0xff]  ;;  %771 = vmatpush2.msra.mxu1 %v297_v54  ;;  %701 = vmatprep.subr.mxu0 %v166_v56  ;;  %v1866_v10 = vcombine.high %v1858_v1, %v1858_v1 }
  0x78   :  { %v293_v59 = vld [vmem:[#allocation2 + $0x660] sm:$0xff]  ;;  %v162_v60 = vld [vmem:[#allocation2 + $0x248] sm:$0xff]  ;;  %772 = vmatprep.subr.mxu1 %v294_v57  ;;  %702 = vmatpush2.msra.mxu0 %v165_v58 }
  0x79   :  { %v290_v61 = vld [vmem:[#allocation2 + $0x648] sm:$0xff]  ;;  %v161_v63 = vld [vmem:[#allocation2 + $0x240] sm:$0xff]  ;;  %773 = vmatpush2.msra.mxu1 %v293_v59  ;;  %703 = vmatprep.subr.mxu0 %v162_v60 }
  0x7a   :  { %v289_v0 = vld [vmem:[#allocation2 + $0x640] sm:$0xff]  ;;  %v158_v2 = vld [vmem:[#allocation2 + $0x228] sm:$0xff]  ;;  %774 = vmatprep.subr.mxu1 %v290_v61  ;;  %704 = vmatpush2.msra.mxu0 %v161_v63 }
  0x7b   :  { %v286_v3 = vld [vmem:[#allocation2 + $0x628] sm:$0xff]  ;;  %v157_v4 = vld [vmem:[#allocation2 + $0x220] sm:$0xff]  ;;  %775 = vmatpush2.msra.mxu1 %v289_v0  ;;  %705 = vmatprep.subr.mxu0 %v158_v2 }
  0x7c   :  { %v285_v5 = vld [vmem:[#allocation2 + $0x620] sm:$0xff]  ;;  %v154_v6 = vld [vmem:[#allocation2 + $0x208] sm:$0xff]  ;;  %776 = vmatprep.subr.mxu1 %v286_v3  ;;  %706 = vmatpush2.msra.mxu0 %v157_v4 }
  0x7d   :  { %v282_v7 = vld [vmem:[#allocation2 + $0x608] sm:$0xff]  ;;  %v153_v9 = vld [vmem:[#allocation2 + $0x200] sm:$0xff]  ;;  %777 = vmatpush2.msra.mxu1 %v285_v5  ;;  %707 = vmatprep.subr.mxu0 %v154_v6 }
  0x7e   :  { %v281_v11 = vld [vmem:[#allocation2 + $0x600] sm:$0xff]  ;;  %778 = vmatprep.subr.mxu1 %v282_v7  ;;  %708 = vmatpush2.msra.mxu0 %v153_v9  ;;  %v406_v12 = vld [vmem:[#allocation2 + $0x9e8] sm:$0xff] }
  0x7f   :  { %709 = vmatprep.mubr.f32.mxu0 %v1862_v8  ;;  %v534_v13 = vld [vmem:[#allocation2 + $0xde8] sm:$0xff]  ;;  %779 = vmatpush2.msra.mxu1 %v281_v11  ;;  %v405_v14 = vld [vmem:[#allocation2 + $0x9e0] sm:$0xff] }
  0x80   :  { %780 = vmatprep.mubr.f32.mxu1 %v1866_v10  ;;  %v533_v15 = vld [vmem:[#allocation2 + $0xde0] sm:$0xff]  ;;  %710 = vmatmul.mubr.f32.vlgmr.msra.gmra.mxu0 %v1855_v62  ;;  %v402_v16 = vld [vmem:[#allocation2 + $0x9c8] sm:$0xff] }
  0x81   :  { %781 = vmatmul.mubr.f32.vlgmr.msra.gmra.mxu1 %v1858_v1  ;;  %v530_v17 = vld [vmem:[#allocation2 + $0xdc8] sm:$0xff]  ;;  %787 = vmatprep.subr.mxu0 %v406_v12  ;;  %v401_v18 = vld [vmem:[#allocation2 + $0x9c0] sm:$0xff] }
  0x82   :  { %858 = vmatprep.subr.mxu1 %v534_v13  ;;  %v529_v19 = vld [vmem:[#allocation2 + $0xdc0] sm:$0xff]  ;;  %788 = vmatpush1.msra.mxu0 %v405_v14  ;;  %v398_v20 = vld [vmem:[#allocation2 + $0x9a8] sm:$0xff] }
  0x83   :  { %859 = vmatpush1.msra.mxu1 %v533_v15  ;;  %v526_v21 = vld [vmem:[#allocation2 + $0xda8] sm:$0xff]  ;;  %789 = vmatprep.subr.mxu0 %v402_v16  ;;  %v397_v22 = vld [vmem:[#allocation2 + $0x9a0] sm:$0xff] }
  0x84   :  { %860 = vmatprep.subr.mxu1 %v530_v17  ;;  %v525_v23 = vld [vmem:[#allocation2 + $0xda0] sm:$0xff]  ;;  %790 = vmatpush1.msra.mxu0 %v401_v18  ;;  %v394_v24 = vld [vmem:[#allocation2 + $0x988] sm:$0xff] }
  0x85   :  { %861 = vmatpush1.msra.mxu1 %v529_v19  ;;  %v522_v25 = vld [vmem:[#allocation2 + $0xd88] sm:$0xff]  ;;  %791 = vmatprep.subr.mxu0 %v398_v20  ;;  %v393_v26 = vld [vmem:[#allocation2 + $0x980] sm:$0xff] }
  0x86   :  { %862 = vmatprep.subr.mxu1 %v526_v21  ;;  %v521_v27 = vld [vmem:[#allocation2 + $0xd80] sm:$0xff]  ;;  %792 = vmatpush1.msra.mxu0 %v397_v22  ;;  %v390_v28 = vld [vmem:[#allocation2 + $0x968] sm:$0xff] }
  0x87   :  { %863 = vmatpush1.msra.mxu1 %v525_v23  ;;  %v518_v29 = vld [vmem:[#allocation2 + $0xd68] sm:$0xff]  ;;  %793 = vmatprep.subr.mxu0 %v394_v24  ;;  %v389_v30 = vld [vmem:[#allocation2 + $0x960] sm:$0xff] }
  0x88   :  { %864 = vmatprep.subr.mxu1 %v522_v25  ;;  %v517_v31 = vld [vmem:[#allocation2 + $0xd60] sm:$0xff]  ;;  %794 = vmatpush1.msra.mxu0 %v393_v26  ;;  %v386_v32 = vld [vmem:[#allocation2 + $0x948] sm:$0xff] }
  0x89   :  { %865 = vmatpush1.msra.mxu1 %v521_v27  ;;  %v514_v33 = vld [vmem:[#allocation2 + $0xd48] sm:$0xff]  ;;  %795 = vmatprep.subr.mxu0 %v390_v28  ;;  %v385_v34 = vld [vmem:[#allocation2 + $0x940] sm:$0xff] }
  0x8a   :  { %866 = vmatprep.subr.mxu1 %v518_v29  ;;  %v513_v35 = vld [vmem:[#allocation2 + $0xd40] sm:$0xff]  ;;  %796 = vmatpush1.msra.mxu0 %v389_v30  ;;  %v382_v36 = vld [vmem:[#allocation2 + $0x928] sm:$0xff] }
  0x8b   :  { %867 = vmatpush1.msra.mxu1 %v517_v31  ;;  %v510_v37 = vld [vmem:[#allocation2 + $0xd28] sm:$0xff]  ;;  %797 = vmatprep.subr.mxu0 %v386_v32  ;;  %v381_v38 = vld [vmem:[#allocation2 + $0x920] sm:$0xff] }
  0x8c   :  { %868 = vmatprep.subr.mxu1 %v514_v33  ;;  %v509_v39 = vld [vmem:[#allocation2 + $0xd20] sm:$0xff]  ;;  %798 = vmatpush1.msra.mxu0 %v385_v34  ;;  %v378_v40 = vld [vmem:[#allocation2 + $0x908] sm:$0xff] }
  0x8d   :  { %869 = vmatpush1.msra.mxu1 %v513_v35  ;;  %v506_v41 = vld [vmem:[#allocation2 + $0xd08] sm:$0xff]  ;;  %799 = vmatprep.subr.mxu0 %v382_v36  ;;  %v377_v42 = vld [vmem:[#allocation2 + $0x900] sm:$0xff] }
  0x8e   :  { %870 = vmatprep.subr.mxu1 %v510_v37  ;;  %v505_v43 = vld [vmem:[#allocation2 + $0xd00] sm:$0xff]  ;;  %800 = vmatpush1.msra.mxu0 %v381_v38  ;;  %v374_v44 = vld [vmem:[#allocation2 + $0x8e8] sm:$0xff] }
  0x8f   :  { %871 = vmatpush1.msra.mxu1 %v509_v39  ;;  %v502_v45 = vld [vmem:[#allocation2 + $0xce8] sm:$0xff]  ;;  %801 = vmatprep.subr.mxu0 %v378_v40  ;;  %v373_v46 = vld [vmem:[#allocation2 + $0x8e0] sm:$0xff] }
  0x90   :  { %872 = vmatprep.subr.mxu1 %v506_v41  ;;  %v501_v47 = vld [vmem:[#allocation2 + $0xce0] sm:$0xff]  ;;  %802 = vmatpush1.msra.mxu0 %v377_v42  ;;  %v370_v48 = vld [vmem:[#allocation2 + $0x8c8] sm:$0xff] }
  0x91   :  { %873 = vmatpush1.msra.mxu1 %v505_v43  ;;  %v498_v49 = vld [vmem:[#allocation2 + $0xcc8] sm:$0xff]  ;;  %803 = vmatprep.subr.mxu0 %v374_v44  ;;  %v369_v50 = vld [vmem:[#allocation2 + $0x8c0] sm:$0xff] }
  0x92   :  { %874 = vmatprep.subr.mxu1 %v502_v45  ;;  %v497_v51 = vld [vmem:[#allocation2 + $0xcc0] sm:$0xff]  ;;  %804 = vmatpush1.msra.mxu0 %v373_v46  ;;  %v366_v53 = vld [vmem:[#allocation2 + $0x8a8] sm:$0xff] }
  0x93   :  { %875 = vmatpush1.msra.mxu1 %v501_v47  ;;  %v494_v54 = vld [vmem:[#allocation2 + $0xca8] sm:$0xff]  ;;  %805 = vmatprep.subr.mxu0 %v370_v48  ;;  %v365_v55 = vld [vmem:[#allocation2 + $0x8a0] sm:$0xff] }
  0x94   :  { %876 = vmatprep.subr.mxu1 %v498_v49  ;;  %v493_v56 = vld [vmem:[#allocation2 + $0xca0] sm:$0xff]  ;;  %806 = vmatpush1.msra.mxu0 %v369_v50  ;;  %v362_v57 = vld [vmem:[#allocation2 + $0x888] sm:$0xff] }
  0x95   :  { %877 = vmatpush1.msra.mxu1 %v497_v51  ;;  %v490_v58 = vld [vmem:[#allocation2 + $0xc88] sm:$0xff]  ;;  %807 = vmatprep.subr.mxu0 %v366_v53  ;;  %v361_v59 = vld [vmem:[#allocation2 + $0x880] sm:$0xff] }
  0x96   :  { %878 = vmatprep.subr.mxu1 %v494_v54  ;;  %v489_v60 = vld [vmem:[#allocation2 + $0xc80] sm:$0xff]  ;;  %808 = vmatpush1.msra.mxu0 %v365_v55  ;;  %v358_v61 = vld [vmem:[#allocation2 + $0x868] sm:$0xff] }
  0x97   :  { %879 = vmatpush1.msra.mxu1 %v493_v56  ;;  %v486_v63 = vld [vmem:[#allocation2 + $0xc68] sm:$0xff]  ;;  %809 = vmatprep.subr.mxu0 %v362_v57  ;;  %v357_v0 = vld [vmem:[#allocation2 + $0x860] sm:$0xff] }
  0x98   :  { %880 = vmatprep.subr.mxu1 %v490_v58  ;;  %v485_v2 = vld [vmem:[#allocation2 + $0xc60] sm:$0xff]  ;;  %810 = vmatpush1.msra.mxu0 %v361_v59  ;;  %v354_v3 = vld [vmem:[#allocation2 + $0x848] sm:$0xff] }
  0x99   :  { %881 = vmatpush1.msra.mxu1 %v489_v60  ;;  %v482_v4 = vld [vmem:[#allocation2 + $0xc48] sm:$0xff]  ;;  %811 = vmatprep.subr.mxu0 %v358_v61  ;;  %v353_v5 = vld [vmem:[#allocation2 + $0x840] sm:$0xff] }
  0x9a   :  { %882 = vmatprep.subr.mxu1 %v486_v63  ;;  %v481_v6 = vld [vmem:[#allocation2 + $0xc40] sm:$0xff]  ;;  %812 = vmatpush1.msra.mxu0 %v357_v0  ;;  %v350_v7 = vld [vmem:[#allocation2 + $0x828] sm:$0xff] }
  0x9b   :  { %883 = vmatpush1.msra.mxu1 %v485_v2  ;;  %v478_v9 = vld [vmem:[#allocation2 + $0xc28] sm:$0xff]  ;;  %813 = vmatprep.subr.mxu0 %v354_v3  ;;  %v349_v11 = vld [vmem:[#allocation2 + $0x820] sm:$0xff] }
  0x9c   :  { %884 = vmatprep.subr.mxu1 %v482_v4  ;;  %v477_v12 = vld [vmem:[#allocation2 + $0xc20] sm:$0xff]  ;;  %814 = vmatpush1.msra.mxu0 %v353_v5  ;;  %v346_v13 = vld [vmem:[#allocation2 + $0x808] sm:$0xff] }
  0x9d   :  { %885 = vmatpush1.msra.mxu1 %v481_v6  ;;  %v474_v14 = vld [vmem:[#allocation2 + $0xc08] sm:$0xff]  ;;  %815 = vmatprep.subr.mxu0 %v350_v7  ;;  %v345_v15 = vld [vmem:[#allocation2 + $0x800] sm:$0xff] }
  0x9e   :  { %886 = vmatprep.subr.mxu1 %v478_v9  ;;  %v473_v16 = vld [vmem:[#allocation2 + $0xc00] sm:$0xff]  ;;  %816 = vmatpush1.msra.mxu0 %v349_v11  ;;  %v470_v17 = vld [vmem:[#allocation2 + $0xbe8] sm:$0xff] }
  0x9f   :  { %887 = vmatpush1.msra.mxu1 %v477_v12  ;;  %v598_v18 = vld [vmem:[#allocation2 + $0xfe8] sm:$0xff]  ;;  %817 = vmatprep.subr.mxu0 %v346_v13  ;;  %v469_v19 = vld [vmem:[#allocation2 + $0xbe0] sm:$0xff] }
  0xa0   :  { %888 = vmatprep.subr.mxu1 %v474_v14  ;;  %v597_v20 = vld [vmem:[#allocation2 + $0xfe0] sm:$0xff]  ;;  %818 = vmatpush1.msra.mxu0 %v345_v15  ;;  %v466_v21 = vld [vmem:[#allocation2 + $0xbc8] sm:$0xff] }
  0xa1   :  { %889 = vmatpush1.msra.mxu1 %v473_v16  ;;  %v594_v22 = vld [vmem:[#allocation2 + $0xfc8] sm:$0xff]  ;;  %819 = vmatprep.subr.mxu0 %v470_v17  ;;  %v465_v23 = vld [vmem:[#allocation2 + $0xbc0] sm:$0xff] }
  0xa2   :  { %890 = vmatprep.subr.mxu1 %v598_v18  ;;  %v593_v24 = vld [vmem:[#allocation2 + $0xfc0] sm:$0xff]  ;;  %820 = vmatpush2.msra.mxu0 %v469_v19  ;;  %v462_v25 = vld [vmem:[#allocation2 + $0xba8] sm:$0xff] }
  0xa3   :  { %891 = vmatpush2.msra.mxu1 %v597_v20  ;;  %v590_v26 = vld [vmem:[#allocation2 + $0xfa8] sm:$0xff]  ;;  %821 = vmatprep.subr.mxu0 %v466_v21  ;;  %v461_v27 = vld [vmem:[#allocation2 + $0xba0] sm:$0xff] }
  0xa4   :  { %892 = vmatprep.subr.mxu1 %v594_v22  ;;  %v589_v28 = vld [vmem:[#allocation2 + $0xfa0] sm:$0xff]  ;;  %822 = vmatpush2.msra.mxu0 %v465_v23  ;;  %v458_v29 = vld [vmem:[#allocation2 + $0xb88] sm:$0xff] }
  0xa5   :  { %893 = vmatpush2.msra.mxu1 %v593_v24  ;;  %v586_v30 = vld [vmem:[#allocation2 + $0xf88] sm:$0xff]  ;;  %823 = vmatprep.subr.mxu0 %v462_v25  ;;  %v457_v31 = vld [vmem:[#allocation2 + $0xb80] sm:$0xff] }
  0xa6   :  { %894 = vmatprep.subr.mxu1 %v590_v26  ;;  %v585_v32 = vld [vmem:[#allocation2 + $0xf80] sm:$0xff]  ;;  %824 = vmatpush2.msra.mxu0 %v461_v27  ;;  %v454_v33 = vld [vmem:[#allocation2 + $0xb68] sm:$0xff]  ;;  %v152_v27 = vld [vmem:[#allocation2 + $0x1f8] sm:$0xff] }
  0xa7   :  { %895 = vmatpush2.msra.mxu1 %v589_v28  ;;  %v582_v34 = vld [vmem:[#allocation2 + $0xf68] sm:$0xff]  ;;  %825 = vmatprep.subr.mxu0 %v458_v29  ;;  %v453_v35 = vld [vmem:[#allocation2 + $0xb60] sm:$0xff]  ;;  %v280_v28 = vld [vmem:[#allocation2 + $0x5f8] sm:$0xff] }
  0xa8   :  { %896 = vmatprep.subr.mxu1 %v586_v30  ;;  %v581_v36 = vld [vmem:[#allocation2 + $0xf60] sm:$0xff]  ;;  %826 = vmatpush2.msra.mxu0 %v457_v31  ;;  %v450_v37 = vld [vmem:[#allocation2 + $0xb48] sm:$0xff]  ;;  %v151_v29 = vld [vmem:[#allocation2 + $0x1f0] sm:$0xff] }
  0xa9   :  { %897 = vmatpush2.msra.mxu1 %v585_v32  ;;  %v578_v38 = vld [vmem:[#allocation2 + $0xf48] sm:$0xff]  ;;  %827 = vmatprep.subr.mxu0 %v454_v33  ;;  %v449_v39 = vld [vmem:[#allocation2 + $0xb40] sm:$0xff]  ;;  %v279_v30 = vld [vmem:[#allocation2 + $0x5f0] sm:$0xff] }
  0xaa   :  { %898 = vmatprep.subr.mxu1 %v582_v34  ;;  %v577_v40 = vld [vmem:[#allocation2 + $0xf40] sm:$0xff]  ;;  %828 = vmatpush2.msra.mxu0 %v453_v35  ;;  %v446_v41 = vld [vmem:[#allocation2 + $0xb28] sm:$0xff]  ;;  %v148_v31 = vld [vmem:[#allocation2 + $0x1d8] sm:$0xff] }
  0xab   :  { %899 = vmatpush2.msra.mxu1 %v581_v36  ;;  %v574_v42 = vld [vmem:[#allocation2 + $0xf28] sm:$0xff]  ;;  %829 = vmatprep.subr.mxu0 %v450_v37  ;;  %v445_v43 = vld [vmem:[#allocation2 + $0xb20] sm:$0xff]  ;;  %v276_v32 = vld [vmem:[#allocation2 + $0x5d8] sm:$0xff] }
  0xac   :  { %900 = vmatprep.subr.mxu1 %v578_v38  ;;  %v573_v44 = vld [vmem:[#allocation2 + $0xf20] sm:$0xff]  ;;  %830 = vmatpush2.msra.mxu0 %v449_v39  ;;  %v442_v45 = vld [vmem:[#allocation2 + $0xb08] sm:$0xff]  ;;  %v147_v33 = vld [vmem:[#allocation2 + $0x1d0] sm:$0xff] }
  0xad   :  { %901 = vmatpush2.msra.mxu1 %v577_v40  ;;  %v570_v46 = vld [vmem:[#allocation2 + $0xf08] sm:$0xff]  ;;  %831 = vmatprep.subr.mxu0 %v446_v41  ;;  %v441_v47 = vld [vmem:[#allocation2 + $0xb00] sm:$0xff]  ;;  %v275_v34 = vld [vmem:[#allocation2 + $0x5d0] sm:$0xff] }
  0xae   :  { %902 = vmatprep.subr.mxu1 %v574_v42  ;;  %v569_v48 = vld [vmem:[#allocation2 + $0xf00] sm:$0xff]  ;;  %832 = vmatpush2.msra.mxu0 %v445_v43  ;;  %v438_v49 = vld [vmem:[#allocation2 + $0xae8] sm:$0xff]  ;;  %v144_v35 = vld [vmem:[#allocation2 + $0x1b8] sm:$0xff] }
  0xaf   :  { %903 = vmatpush2.msra.mxu1 %v573_v44  ;;  %v566_v50 = vld [vmem:[#allocation2 + $0xee8] sm:$0xff]  ;;  %833 = vmatprep.subr.mxu0 %v442_v45  ;;  %v437_v51 = vld [vmem:[#allocation2 + $0xae0] sm:$0xff]  ;;  %v272_v36 = vld [vmem:[#allocation2 + $0x5b8] sm:$0xff] }
  0xb0   :  { %904 = vmatprep.subr.mxu1 %v570_v46  ;;  %v565_v53 = vld [vmem:[#allocation2 + $0xee0] sm:$0xff]  ;;  %834 = vmatpush2.msra.mxu0 %v441_v47  ;;  %v434_v54 = vld [vmem:[#allocation2 + $0xac8] sm:$0xff]  ;;  %v143_v37 = vld [vmem:[#allocation2 + $0x1b0] sm:$0xff] }
  0xb1   :  { %905 = vmatpush2.msra.mxu1 %v569_v48  ;;  %v562_v55 = vld [vmem:[#allocation2 + $0xec8] sm:$0xff]  ;;  %835 = vmatprep.subr.mxu0 %v438_v49  ;;  %v433_v56 = vld [vmem:[#allocation2 + $0xac0] sm:$0xff]  ;;  %v271_v38 = vld [vmem:[#allocation2 + $0x5b0] sm:$0xff] }
  0xb2   :  { %906 = vmatprep.subr.mxu1 %v566_v50  ;;  %v561_v57 = vld [vmem:[#allocation2 + $0xec0] sm:$0xff]  ;;  %836 = vmatpush2.msra.mxu0 %v437_v51  ;;  %v430_v58 = vld [vmem:[#allocation2 + $0xaa8] sm:$0xff]  ;;  %v140_v39 = vld [vmem:[#allocation2 + $0x198] sm:$0xff] }
  0xb3   :  { %907 = vmatpush2.msra.mxu1 %v565_v53  ;;  %v558_v59 = vld [vmem:[#allocation2 + $0xea8] sm:$0xff]  ;;  %837 = vmatprep.subr.mxu0 %v434_v54  ;;  %v429_v60 = vld [vmem:[#allocation2 + $0xaa0] sm:$0xff]  ;;  %v268_v40 = vld [vmem:[#allocation2 + $0x598] sm:$0xff] }
  0xb4   :  { %908 = vmatprep.subr.mxu1 %v562_v55  ;;  %v557_v61 = vld [vmem:[#allocation2 + $0xea0] sm:$0xff]  ;;  %v88_v63 = vld [vmem:[%s1921_s0 + $0x8] sm:$0xff]  ;;  %838 = vmatpush2.msra.mxu0 %v433_v56  ;;  %v139_v41 = vld [vmem:[#allocation2 + $0x190] sm:$0xff] }
  0xb5   :  { %909 = vmatpush2.msra.mxu1 %v561_v57  ;;  %v426_v0 = vld [vmem:[#allocation2 + $0xa88] sm:$0xff]  ;;  %839 = vmatprep.subr.mxu0 %v430_v58  ;;  %v425_v3 = vld [vmem:[#allocation2 + $0xa80] sm:$0xff]  ;;  %v620_v7 = vcombine.high %v88_v63, %v88_v63  ;;  %v1876_v14 = vrot.slane %v88_v63, %v1852_v52  ;;  %v267_v42 = vld [vmem:[#allocation2 + $0x590] sm:$0xff] }
  0xb6   :  { %v554_v2 = vld [vmem:[#allocation2 + $0xe88] sm:$0xff]  ;;  %910 = vmatprep.subr.mxu1 %v558_v59  ;;  %v553_v4 = vld [vmem:[#allocation2 + $0xe80] sm:$0xff]  ;;  %840 = vmatpush2.msra.mxu0 %v429_v60  ;;  %v136_v43 = vld [vmem:[#allocation2 + $0x178] sm:$0xff] }
  0xb7   :  { %911 = vmatpush2.msra.mxu1 %v557_v61  ;;  %v422_v5 = vld [vmem:[#allocation2 + $0xa68] sm:$0xff]  ;;  %841 = vmatprep.subr.mxu0 %v426_v0  ;;  %v421_v9 = vld [vmem:[#allocation2 + $0xa60] sm:$0xff]  ;;  %v1879_v19 = vrot.slane %v620_v7, %v1852_v52  ;;  %v1883_v24 = vcombine.high %v1876_v14, %v1876_v14  ;;  %v264_v44 = vld [vmem:[#allocation2 + $0x578] sm:$0xff] }
  0xb8   :  { %v550_v6 = vld [vmem:[#allocation2 + $0xe68] sm:$0xff]  ;;  %912 = vmatprep.subr.mxu1 %v554_v2  ;;  %v549_v11 = vld [vmem:[#allocation2 + $0xe60] sm:$0xff]  ;;  %842 = vmatpush2.msra.mxu0 %v425_v3  ;;  %v135_v45 = vld [vmem:[#allocation2 + $0x170] sm:$0xff] }
  0xb9   :  { %913 = vmatpush2.msra.mxu1 %v553_v4  ;;  %v418_v12 = vld [vmem:[#allocation2 + $0xa48] sm:$0xff]  ;;  %843 = vmatprep.subr.mxu0 %v422_v5  ;;  %v417_v15 = vld [vmem:[#allocation2 + $0xa40] sm:$0xff]  ;;  %v1887_v52 = vcombine.high %v1879_v19, %v1879_v19  ;;  %v263_v46 = vld [vmem:[#allocation2 + $0x570] sm:$0xff] }
  0xba   :  { %v546_v13 = vld [vmem:[#allocation2 + $0xe48] sm:$0xff]  ;;  %914 = vmatprep.subr.mxu1 %v550_v6  ;;  %v545_v16 = vld [vmem:[#allocation2 + $0xe40] sm:$0xff]  ;;  %844 = vmatpush2.msra.mxu0 %v421_v9  ;;  %v132_v47 = vld [vmem:[#allocation2 + $0x158] sm:$0xff] }
  0xbb   :  { %915 = vmatpush2.msra.mxu1 %v549_v11  ;;  %v414_v17 = vld [vmem:[#allocation2 + $0xa28] sm:$0xff]  ;;  %845 = vmatprep.subr.mxu0 %v418_v12  ;;  %v413_v20 = vld [vmem:[#allocation2 + $0xa20] sm:$0xff]  ;;  %v260_v48 = vld [vmem:[#allocation2 + $0x558] sm:$0xff] }
  0xbc   :  { %v542_v18 = vld [vmem:[#allocation2 + $0xe28] sm:$0xff]  ;;  %916 = vmatprep.subr.mxu1 %v546_v13  ;;  %v541_v21 = vld [vmem:[#allocation2 + $0xe20] sm:$0xff]  ;;  %846 = vmatpush2.msra.mxu0 %v417_v15  ;;  %v131_v49 = vld [vmem:[#allocation2 + $0x150] sm:$0xff] }
  0xbd   :  { %917 = vmatpush2.msra.mxu1 %v545_v16  ;;  %v410_v22 = vld [vmem:[#allocation2 + $0xa08] sm:$0xff]  ;;  %847 = vmatprep.subr.mxu0 %v414_v17  ;;  %v409_v25 = vld [vmem:[#allocation2 + $0xa00] sm:$0xff]  ;;  %v259_v50 = vld [vmem:[#allocation2 + $0x550] sm:$0xff] }
  0xbe   :  { %v538_v23 = vld [vmem:[#allocation2 + $0xe08] sm:$0xff]  ;;  %918 = vmatprep.subr.mxu1 %v542_v18  ;;  %848 = vmatpush2.msra.mxu0 %v413_v20  ;;  %v537_v26 = vld [vmem:[#allocation2 + $0xe00] sm:$0xff]  ;;  %v128_v51 = vld [vmem:[#allocation2 + $0x138] sm:$0xff] }
  0xbf   :  { %919 = vmatpush2.msra.mxu1 %v541_v21  ;;  %849 = vmatprep.subr.mxu0 %v410_v22  ;;  %v256_v53 = vld [vmem:[#allocation2 + $0x538] sm:$0xff]  ;;  %v127_v54 = vld [vmem:[#allocation2 + $0x130] sm:$0xff] }
  0xc0   :  { %920 = vmatprep.subr.mxu1 %v538_v23  ;;  %850 = vmatpush2.msra.mxu0 %v409_v25  ;;  %v255_v55 = vld [vmem:[#allocation2 + $0x530] sm:$0xff]  ;;  %v124_v56 = vld [vmem:[#allocation2 + $0x118] sm:$0xff] }
  0xc1   :  { %851 = vmatprep.mubr.f32.mxu0 %v1883_v24  ;;  %921 = vmatpush2.msra.mxu1 %v537_v26  ;;  %v252_v57 = vld [vmem:[#allocation2 + $0x518] sm:$0xff]  ;;  %v123_v58 = vld [vmem:[#allocation2 + $0x110] sm:$0xff] }
  0xc2   :  { %852 = vmatmul.mubr.f32.vlgmr.msra.gmra.mxu0 %v1876_v14  ;;  %922 = vmatprep.mubr.f32.mxu1 %v1887_v52  ;;  %v251_v59 = vld [vmem:[#allocation2 + $0x510] sm:$0xff]  ;;  %v120_v60 = vld [vmem:[#allocation2 + $0xf8] sm:$0xff] }
  0xc3   :  { %929 = vmatprep.subr.mxu0 %v152_v27  ;;  %1000 = vmatprep.subr.mxu1 %v280_v28  ;;  %v248_v61 = vld [vmem:[#allocation2 + $0x4f8] sm:$0xff]  ;;  %v119_v63 = vld [vmem:[#allocation2 + $0xf0] sm:$0xff] }
  0xc4   :  { %923 = vmatmul.mubr.f32.vlgmr.msra.gmra.mxu1 %v1879_v19  ;;  %930 = vmatpush1.msra.mxu0 %v151_v29  ;;  %v247_v0 = vld [vmem:[#allocation2 + $0x4f0] sm:$0xff]  ;;  %v116_v2 = vld [vmem:[#allocation2 + $0xd8] sm:$0xff] }
  0xc5   :  { %1001 = vmatpush1.msra.mxu1 %v279_v30  ;;  %931 = vmatprep.subr.mxu0 %v148_v31  ;;  %v244_v3 = vld [vmem:[#allocation2 + $0x4d8] sm:$0xff]  ;;  %v115_v4 = vld [vmem:[#allocation2 + $0xd0] sm:$0xff] }
  0xc6   :  { %1002 = vmatprep.subr.mxu1 %v276_v32  ;;  %932 = vmatpush1.msra.mxu0 %v147_v33  ;;  %v243_v5 = vld [vmem:[#allocation2 + $0x4d0] sm:$0xff]  ;;  %v112_v6 = vld [vmem:[#allocation2 + $0xb8] sm:$0xff] }
  0xc7   :  { %1003 = vmatpush1.msra.mxu1 %v275_v34  ;;  %933 = vmatprep.subr.mxu0 %v144_v35  ;;  %v240_v7 = vld [vmem:[#allocation2 + $0x4b8] sm:$0xff]  ;;  %v111_v9 = vld [vmem:[#allocation2 + $0xb0] sm:$0xff] }
  0xc8   :  { %1004 = vmatprep.subr.mxu1 %v272_v36  ;;  %934 = vmatpush1.msra.mxu0 %v143_v37  ;;  %v239_v11 = vld [vmem:[#allocation2 + $0x4b0] sm:$0xff]  ;;  %v108_v12 = vld [vmem:[#allocation2 + $0x98] sm:$0xff] }
  0xc9   :  { %1005 = vmatpush1.msra.mxu1 %v271_v38  ;;  %935 = vmatprep.subr.mxu0 %v140_v39  ;;  %v236_v13 = vld [vmem:[#allocation2 + $0x498] sm:$0xff]  ;;  %v107_v15 = vld [vmem:[#allocation2 + $0x90] sm:$0xff] }
  0xca   :  { %1006 = vmatprep.subr.mxu1 %v268_v40  ;;  %936 = vmatpush1.msra.mxu0 %v139_v41  ;;  %v235_v16 = vld [vmem:[#allocation2 + $0x490] sm:$0xff]  ;;  %v104_v17 = vld [vmem:[#allocation2 + $0x78] sm:$0xff] }
  0xcb   :  { %1007 = vmatpush1.msra.mxu1 %v267_v42  ;;  %937 = vmatprep.subr.mxu0 %v136_v43  ;;  %v232_v18 = vld [vmem:[#allocation2 + $0x478] sm:$0xff]  ;;  %v103_v20 = vld [vmem:[#allocation2 + $0x70] sm:$0xff] }
  0xcc   :  { %1008 = vmatprep.subr.mxu1 %v264_v44  ;;  %938 = vmatpush1.msra.mxu0 %v135_v45  ;;  %v231_v21 = vld [vmem:[#allocation2 + $0x470] sm:$0xff]  ;;  %v100_v22 = vld [vmem:[#allocation2 + $0x58] sm:$0xff] }
  0xcd   :  { %1009 = vmatpush1.msra.mxu1 %v263_v46  ;;  %939 = vmatprep.subr.mxu0 %v132_v47  ;;  %v228_v23 = vld [vmem:[#allocation2 + $0x458] sm:$0xff]  ;;  %v99_v25 = vld [vmem:[#allocation2 + $0x50] sm:$0xff] }
  0xce   :  { %1010 = vmatprep.subr.mxu1 %v260_v48  ;;  %940 = vmatpush1.msra.mxu0 %v131_v49  ;;  %v227_v26 = vld [vmem:[#allocation2 + $0x450] sm:$0xff]  ;;  %v96_v27 = vld [vmem:[#allocation2 + $0x38] sm:$0xff] }
  0xcf   :  { %1011 = vmatpush1.msra.mxu1 %v259_v50  ;;  %941 = vmatprep.subr.mxu0 %v128_v51  ;;  %v224_v28 = vld [vmem:[#allocation2 + $0x438] sm:$0xff]  ;;  %v95_v29 = vld [vmem:[#allocation2 + $0x30] sm:$0xff] }
  0xd0   :  { %1012 = vmatprep.subr.mxu1 %v256_v53  ;;  %942 = vmatpush1.msra.mxu0 %v127_v54  ;;  %v223_v30 = vld [vmem:[#allocation2 + $0x430] sm:$0xff]  ;;  %v92_v31 = vld [vmem:[#allocation2 + $0x18] sm:$0xff] }
  0xd1   :  { %1013 = vmatpush1.msra.mxu1 %v255_v55  ;;  %943 = vmatprep.subr.mxu0 %v124_v56  ;;  %v220_v32 = vld [vmem:[#allocation2 + $0x418] sm:$0xff]  ;;  %v91_v33 = vld [vmem:[#allocation2 + $0x10] sm:$0xff] }
  0xd2   :  { %1014 = vmatprep.subr.mxu1 %v252_v57  ;;  %944 = vmatpush1.msra.mxu0 %v123_v58  ;;  %v219_v34 = vld [vmem:[#allocation2 + $0x410] sm:$0xff]  ;;  %v216_v35 = vld [vmem:[#allocation2 + $0x3f8] sm:$0xff] }
  0xd3   :  { %1015 = vmatpush1.msra.mxu1 %v251_v59  ;;  %945 = vmatprep.subr.mxu0 %v120_v60  ;;  %v344_v36 = vld [vmem:[#allocation2 + $0x7f8] sm:$0xff]  ;;  %v215_v37 = vld [vmem:[#allocation2 + $0x3f0] sm:$0xff] }
  0xd4   :  { %1016 = vmatprep.subr.mxu1 %v248_v61  ;;  %946 = vmatpush1.msra.mxu0 %v119_v63  ;;  %v343_v38 = vld [vmem:[#allocation2 + $0x7f0] sm:$0xff]  ;;  %v212_v39 = vld [vmem:[#allocation2 + $0x3d8] sm:$0xff] }
  0xd5   :  { %1017 = vmatpush1.msra.mxu1 %v247_v0  ;;  %947 = vmatprep.subr.mxu0 %v116_v2  ;;  %v340_v40 = vld [vmem:[#allocation2 + $0x7d8] sm:$0xff]  ;;  %v211_v41 = vld [vmem:[#allocation2 + $0x3d0] sm:$0xff] }
  0xd6   :  { %1018 = vmatprep.subr.mxu1 %v244_v3  ;;  %948 = vmatpush1.msra.mxu0 %v115_v4  ;;  %v339_v42 = vld [vmem:[#allocation2 + $0x7d0] sm:$0xff]  ;;  %v208_v43 = vld [vmem:[#allocation2 + $0x3b8] sm:$0xff] }
  0xd7   :  { %1019 = vmatpush1.msra.mxu1 %v243_v5  ;;  %949 = vmatprep.subr.mxu0 %v112_v6  ;;  %v336_v44 = vld [vmem:[#allocation2 + $0x7b8] sm:$0xff]  ;;  %v207_v45 = vld [vmem:[#allocation2 + $0x3b0] sm:$0xff] }
  0xd8   :  { %1020 = vmatprep.subr.mxu1 %v240_v7  ;;  %950 = vmatpush1.msra.mxu0 %v111_v9  ;;  %v335_v46 = vld [vmem:[#allocation2 + $0x7b0] sm:$0xff]  ;;  %v204_v47 = vld [vmem:[#allocation2 + $0x398] sm:$0xff] }
  0xd9   :  { %1021 = vmatpush1.msra.mxu1 %v239_v11  ;;  %951 = vmatprep.subr.mxu0 %v108_v12  ;;  %v332_v48 = vld [vmem:[#allocation2 + $0x798] sm:$0xff]  ;;  %v203_v49 = vld [vmem:[#allocation2 + $0x390] sm:$0xff] }
  0xda   :  { %1022 = vmatprep.subr.mxu1 %v236_v13  ;;  %952 = vmatpush1.msra.mxu0 %v107_v15  ;;  %v331_v50 = vld [vmem:[#allocation2 + $0x790] sm:$0xff]  ;;  %v200_v51 = vld [vmem:[#allocation2 + $0x378] sm:$0xff] }
  0xdb   :  { %1023 = vmatpush1.msra.mxu1 %v235_v16  ;;  %953 = vmatprep.subr.mxu0 %v104_v17  ;;  %v328_v53 = vld [vmem:[#allocation2 + $0x778] sm:$0xff]  ;;  %v199_v54 = vld [vmem:[#allocation2 + $0x370] sm:$0xff] }
  0xdc   :  { %1024 = vmatprep.subr.mxu1 %v232_v18  ;;  %954 = vmatpush1.msra.mxu0 %v103_v20  ;;  %v327_v55 = vld [vmem:[#allocation2 + $0x770] sm:$0xff]  ;;  %v196_v56 = vld [vmem:[#allocation2 + $0x358] sm:$0xff] }
  0xdd   :  { %1025 = vmatpush1.msra.mxu1 %v231_v21  ;;  %955 = vmatprep.subr.mxu0 %v100_v22  ;;  %v324_v57 = vld [vmem:[#allocation2 + $0x758] sm:$0xff]  ;;  %v195_v58 = vld [vmem:[#allocation2 + $0x350] sm:$0xff] }
  0xde   :  { %1026 = vmatprep.subr.mxu1 %v228_v23  ;;  %956 = vmatpush1.msra.mxu0 %v99_v25  ;;  %v323_v59 = vld [vmem:[#allocation2 + $0x750] sm:$0xff]  ;;  %v192_v60 = vld [vmem:[#allocation2 + $0x338] sm:$0xff] }
  0xdf   :  { %1027 = vmatpush1.msra.mxu1 %v227_v26  ;;  %957 = vmatprep.subr.mxu0 %v96_v27  ;;  %v320_v61 = vld [vmem:[#allocation2 + $0x738] sm:$0xff]  ;;  %v191_v63 = vld [vmem:[#allocation2 + $0x330] sm:$0xff] }
  0xe0   :  { %1028 = vmatprep.subr.mxu1 %v224_v28  ;;  %958 = vmatpush1.msra.mxu0 %v95_v29  ;;  %v319_v0 = vld [vmem:[#allocation2 + $0x730] sm:$0xff]  ;;  %v188_v2 = vld [vmem:[#allocation2 + $0x318] sm:$0xff] }
  0xe1   :  { %1029 = vmatpush1.msra.mxu1 %v223_v30  ;;  %959 = vmatprep.subr.mxu0 %v92_v31  ;;  %v316_v3 = vld [vmem:[#allocation2 + $0x718] sm:$0xff]  ;;  %v187_v4 = vld [vmem:[#allocation2 + $0x310] sm:$0xff] }
  0xe2   :  { %1030 = vmatprep.subr.mxu1 %v220_v32  ;;  %960 = vmatpush1.msra.mxu0 %v91_v33  ;;  %v315_v5 = vld [vmem:[#allocation2 + $0x710] sm:$0xff]  ;;  %v184_v6 = vld [vmem:[#allocation2 + $0x2f8] sm:$0xff] }
  0xe3   :  { %1031 = vmatpush1.msra.mxu1 %v219_v34  ;;  %961 = vmatprep.subr.mxu0 %v216_v35  ;;  %v312_v7 = vld [vmem:[#allocation2 + $0x6f8] sm:$0xff]  ;;  %v183_v9 = vld [vmem:[#allocation2 + $0x2f0] sm:$0xff] }
  0xe4   :  { %1032 = vmatprep.subr.mxu1 %v344_v36  ;;  %962 = vmatpush2.msra.mxu0 %v215_v37  ;;  %v311_v11 = vld [vmem:[#allocation2 + $0x6f0] sm:$0xff]  ;;  %v180_v12 = vld [vmem:[#allocation2 + $0x2d8] sm:$0xff] }
  0xe5   :  { %1033 = vmatpush2.msra.mxu1 %v343_v38  ;;  %963 = vmatprep.subr.mxu0 %v212_v39  ;;  %v308_v13 = vld [vmem:[#allocation2 + $0x6d8] sm:$0xff]  ;;  %v179_v15 = vld [vmem:[#allocation2 + $0x2d0] sm:$0xff] }
  0xe6   :  { %1034 = vmatprep.subr.mxu1 %v340_v40  ;;  %964 = vmatpush2.msra.mxu0 %v211_v41  ;;  %v307_v16 = vld [vmem:[#allocation2 + $0x6d0] sm:$0xff]  ;;  %v176_v17 = vld [vmem:[#allocation2 + $0x2b8] sm:$0xff] }
  0xe7   :  { %1035 = vmatpush2.msra.mxu1 %v339_v42  ;;  %965 = vmatprep.subr.mxu0 %v208_v43  ;;  %v304_v18 = vld [vmem:[#allocation2 + $0x6b8] sm:$0xff]  ;;  %v175_v20 = vld [vmem:[#allocation2 + $0x2b0] sm:$0xff] }
  0xe8   :  { %1036 = vmatprep.subr.mxu1 %v336_v44  ;;  %966 = vmatpush2.msra.mxu0 %v207_v45  ;;  %v303_v21 = vld [vmem:[#allocation2 + $0x6b0] sm:$0xff]  ;;  %v172_v22 = vld [vmem:[#allocation2 + $0x298] sm:$0xff] }
  0xe9   :  { %1037 = vmatpush2.msra.mxu1 %v335_v46  ;;  %967 = vmatprep.subr.mxu0 %v204_v47  ;;  %v300_v23 = vld [vmem:[#allocation2 + $0x698] sm:$0xff]  ;;  %v171_v25 = vld [vmem:[#allocation2 + $0x290] sm:$0xff] }
  0xea   :  { %1038 = vmatprep.subr.mxu1 %v332_v48  ;;  %968 = vmatpush2.msra.mxu0 %v203_v49  ;;  %v299_v26 = vld [vmem:[#allocation2 + $0x690] sm:$0xff]  ;;  %v168_v27 = vld [vmem:[#allocation2 + $0x278] sm:$0xff] }
  0xeb   :  { %1039 = vmatpush2.msra.mxu1 %v331_v50  ;;  %969 = vmatprep.subr.mxu0 %v200_v51  ;;  %v296_v28 = vld [vmem:[#allocation2 + $0x678] sm:$0xff]  ;;  %v167_v29 = vld [vmem:[#allocation2 + $0x270] sm:$0xff] }
  0xec   :  { %1040 = vmatprep.subr.mxu1 %v328_v53  ;;  %970 = vmatpush2.msra.mxu0 %v199_v54  ;;  %v295_v30 = vld [vmem:[#allocation2 + $0x670] sm:$0xff]  ;;  %v164_v31 = vld [vmem:[#allocation2 + $0x258] sm:$0xff] }
  0xed   :  { %1041 = vmatpush2.msra.mxu1 %v327_v55  ;;  %971 = vmatprep.subr.mxu0 %v196_v56  ;;  %v292_v32 = vld [vmem:[#allocation2 + $0x658] sm:$0xff]  ;;  %v163_v33 = vld [vmem:[#allocation2 + $0x250] sm:$0xff] }
  0xee   :  { %1042 = vmatprep.subr.mxu1 %v324_v57  ;;  %972 = vmatpush2.msra.mxu0 %v195_v58  ;;  %v291_v34 = vld [vmem:[#allocation2 + $0x650] sm:$0xff]  ;;  %v160_v35 = vld [vmem:[#allocation2 + $0x238] sm:$0xff] }
  0xef   :  { %1043 = vmatpush2.msra.mxu1 %v323_v59  ;;  %973 = vmatprep.subr.mxu0 %v192_v60  ;;  %v288_v36 = vld [vmem:[#allocation2 + $0x638] sm:$0xff]  ;;  %v159_v37 = vld [vmem:[#allocation2 + $0x230] sm:$0xff] }
  0xf0   :  { %1044 = vmatprep.subr.mxu1 %v320_v61  ;;  %974 = vmatpush2.msra.mxu0 %v191_v63  ;;  %v287_v38 = vld [vmem:[#allocation2 + $0x630] sm:$0xff]  ;;  %v156_v39 = vld [vmem:[#allocation2 + $0x218] sm:$0xff] }
  0xf1   :  { %1045 = vmatpush2.msra.mxu1 %v319_v0  ;;  %975 = vmatprep.subr.mxu0 %v188_v2  ;;  %v284_v40 = vld [vmem:[#allocation2 + $0x618] sm:$0xff]  ;;  %v155_v41 = vld [vmem:[#allocation2 + $0x210] sm:$0xff] }
  0xf2   :  { %1046 = vmatprep.subr.mxu1 %v316_v3  ;;  %976 = vmatpush2.msra.mxu0 %v187_v4  ;;  %v283_v42 = vld [vmem:[#allocation2 + $0x610] sm:$0xff]  ;;  %v408_v43 = vld [vmem:[#allocation2 + $0x9f8] sm:$0xff] }
  0xf3   :  { %1047 = vmatpush2.msra.mxu1 %v315_v5  ;;  %977 = vmatprep.subr.mxu0 %v184_v6  ;;  %v536_v44 = vld [vmem:[#allocation2 + $0xdf8] sm:$0xff]  ;;  %v407_v45 = vld [vmem:[#allocation2 + $0x9f0] sm:$0xff] }
  0xf4   :  { %1048 = vmatprep.subr.mxu1 %v312_v7  ;;  %978 = vmatpush2.msra.mxu0 %v183_v9  ;;  %v535_v46 = vld [vmem:[#allocation2 + $0xdf0] sm:$0xff]  ;;  %v404_v47 = vld [vmem:[#allocation2 + $0x9d8] sm:$0xff] }
  0xf5   :  { %1049 = vmatpush2.msra.mxu1 %v311_v11  ;;  %979 = vmatprep.subr.mxu0 %v180_v12  ;;  %v532_v48 = vld [vmem:[#allocation2 + $0xdd8] sm:$0xff]  ;;  %v403_v49 = vld [vmem:[#allocation2 + $0x9d0] sm:$0xff] }
  0xf6   :  { %1050 = vmatprep.subr.mxu1 %v308_v13  ;;  %980 = vmatpush2.msra.mxu0 %v179_v15  ;;  %v531_v50 = vld [vmem:[#allocation2 + $0xdd0] sm:$0xff]  ;;  %v528_v51 = vld [vmem:[#allocation2 + $0xdb8] sm:$0xff] }
  0xf7   :  { %1051 = vmatpush2.msra.mxu1 %v307_v16  ;;  %981 = vmatprep.subr.mxu0 %v176_v17  ;;  %v399_v53 = vld [vmem:[#allocation2 + $0x9b0] sm:$0xff]  ;;  %v396_v54 = vld [vmem:[#allocation2 + $0x998] sm:$0xff] }
  0xf8   :  { %1052 = vmatprep.subr.mxu1 %v304_v18  ;;  %982 = vmatpush2.msra.mxu0 %v175_v20  ;;  %v523_v55 = vld [vmem:[#allocation2 + $0xd90] sm:$0xff]  ;;  %v392_v56 = vld [vmem:[#allocation2 + $0x978] sm:$0xff] }
  0xf9   :  { %1053 = vmatpush2.msra.mxu1 %v303_v21  ;;  %983 = vmatprep.subr.mxu0 %v172_v22  ;;  %v520_v57 = vld [vmem:[#allocation2 + $0xd78] sm:$0xff]  ;;  %v391_v58 = vld [vmem:[#allocation2 + $0x970] sm:$0xff] }
  0xfa   :  { %1054 = vmatprep.subr.mxu1 %v300_v23  ;;  %984 = vmatpush2.msra.mxu0 %v171_v25  ;;  %v519_v59 = vld [vmem:[#allocation2 + $0xd70] sm:$0xff]  ;;  %v388_v60 = vld [vmem:[#allocation2 + $0x958] sm:$0xff] }
  0xfb   :  { %1055 = vmatpush2.msra.mxu1 %v299_v26  ;;  %985 = vmatprep.subr.mxu0 %v168_v27  ;;  %v516_v61 = vld [vmem:[#allocation2 + $0xd58] sm:$0xff]  ;;  %v387_v63 = vld [vmem:[#allocation2 + $0x950] sm:$0xff] }
  0xfc   :  { %1056 = vmatprep.subr.mxu1 %v296_v28  ;;  %986 = vmatpush2.msra.mxu0 %v167_v29  ;;  %v515_v0 = vld [vmem:[#allocation2 + $0xd50] sm:$0xff]  ;;  %v384_v2 = vld [vmem:[#allocation2 + $0x938] sm:$0xff] }
  0xfd   :  { %1057 = vmatpush2.msra.mxu1 %v295_v30  ;;  %987 = vmatprep.subr.mxu0 %v164_v31  ;;  %v512_v3 = vld [vmem:[#allocation2 + $0xd38] sm:$0xff]  ;;  %v383_v4 = vld [vmem:[#allocation2 + $0x930] sm:$0xff] }
  0xfe   :  { %1058 = vmatprep.subr.mxu1 %v292_v32  ;;  %988 = vmatpush2.msra.mxu0 %v163_v33  ;;  %v511_v5 = vld [vmem:[#allocation2 + $0xd30] sm:$0xff]  ;;  %v380_v6 = vld [vmem:[#allocation2 + $0x918] sm:$0xff] }
  0xff   :  { %1059 = vmatpush2.msra.mxu1 %v291_v34  ;;  %989 = vmatprep.subr.mxu0 %v160_v35  ;;  %v508_v7 = vld [vmem:[#allocation2 + $0xd18] sm:$0xff]  ;;  %v379_v9 = vld [vmem:[#allocation2 + $0x910] sm:$0xff] }
 0x100   :  { %1060 = vmatprep.subr.mxu1 %v288_v36  ;;  %990 = vmatpush2.msra.mxu0 %v159_v37  ;;  %v507_v11 = vld [vmem:[#allocation2 + $0xd10] sm:$0xff]  ;;  %v376_v12 = vld [vmem:[#allocation2 + $0x8f8] sm:$0xff] }
 0x101   :  { %1061 = vmatpush2.msra.mxu1 %v287_v38  ;;  %991 = vmatprep.subr.mxu0 %v156_v39  ;;  %v504_v13 = vld [vmem:[#allocation2 + $0xcf8] sm:$0xff]  ;;  %v375_v15 = vld [vmem:[#allocation2 + $0x8f0] sm:$0xff] }
 0x102   :  { %1062 = vmatprep.subr.mxu1 %v284_v40  ;;  %992 = vmatpush2.msra.mxu0 %v155_v41  ;;  %v503_v16 = vld [vmem:[#allocation2 + $0xcf0] sm:$0xff]  ;;  %v372_v17 = vld [vmem:[#allocation2 + $0x8d8] sm:$0xff] }
 0x103   :  { %993 = vmatprep.mubr.f32.mxu0 %v1862_v8  ;;  %1063 = vmatpush2.msra.mxu1 %v283_v42  ;;  %v400_v8 = vld [vmem:[#allocation2 + $0x9b8] sm:$0xff]  ;;  %v371_v20 = vld [vmem:[#allocation2 + $0x8d0] sm:$0xff] }
 0x104   :  { %1064 = vmatprep.mubr.f32.mxu1 %v1866_v10  ;;  %994 = vmatmul.mubr.f32.vlgmr.msra.gmra.mxu0 %v1855_v62  ;;  %v527_v10 = vld [vmem:[#allocation2 + $0xdb0] sm:$0xff]  ;;  %v524_v62 = vld [vmem:[#allocation2 + $0xd98] sm:$0xff] }
 0x105   :  { %1065 = vmatmul.mubr.f32.vlgmr.msra.gmra.mxu1 %v1858_v1  ;;  %1071 = vmatprep.subr.mxu0 %v408_v43  ;;  %v395_v1 = vld [vmem:[#allocation2 + $0x990] sm:$0xff]  ;;  %v500_v18 = vld [vmem:[#allocation2 + $0xcd8] sm:$0xff] }
 0x106   :  { %1142 = vmatprep.subr.mxu1 %v536_v44  ;;  %1072 = vmatpush1.msra.mxu0 %v407_v45  ;;  %v499_v21 = vld [vmem:[#allocation2 + $0xcd0] sm:$0xff]  ;;  %v368_v22 = vld [vmem:[#allocation2 + $0x8b8] sm:$0xff] }
 0x107   :  { %1143 = vmatpush1.msra.mxu1 %v535_v46  ;;  %1073 = vmatprep.subr.mxu0 %v404_v47  ;;  %v496_v23 = vld [vmem:[#allocation2 + $0xcb8] sm:$0xff]  ;;  %v367_v25 = vld [vmem:[#allocation2 + $0x8b0] sm:$0xff] }
 0x108   :  { %1144 = vmatprep.subr.mxu1 %v532_v48  ;;  %1074 = vmatpush1.msra.mxu0 %v403_v49  ;;  %v495_v26 = vld [vmem:[#allocation2 + $0xcb0] sm:$0xff]  ;;  %v364_v27 = vld [vmem:[#allocation2 + $0x898] sm:$0xff] }
 0x109   :  { %1145 = vmatpush1.msra.mxu1 %v531_v50  ;;  %1075 = vmatprep.subr.mxu0 %v400_v8  ;;  %v492_v28 = vld [vmem:[#allocation2 + $0xc98] sm:$0xff]  ;;  %v363_v29 = vld [vmem:[#allocation2 + $0x890] sm:$0xff] }
 0x10a   :  { %1146 = vmatprep.subr.mxu1 %v528_v51  ;;  %1076 = vmatpush1.msra.mxu0 %v399_v53  ;;  %v491_v30 = vld [vmem:[#allocation2 + $0xc90] sm:$0xff]  ;;  %v360_v31 = vld [vmem:[#allocation2 + $0x878] sm:$0xff] }
 0x10b   :  { %1147 = vmatpush1.msra.mxu1 %v527_v10  ;;  %1077 = vmatprep.subr.mxu0 %v396_v54  ;;  %v488_v32 = vld [vmem:[#allocation2 + $0xc78] sm:$0xff]  ;;  %v359_v33 = vld [vmem:[#allocation2 + $0x870] sm:$0xff] }
 0x10c   :  { %1148 = vmatprep.subr.mxu1 %v524_v62  ;;  %1078 = vmatpush1.msra.mxu0 %v395_v1  ;;  %v487_v34 = vld [vmem:[#allocation2 + $0xc70] sm:$0xff]  ;;  %v356_v35 = vld [vmem:[#allocation2 + $0x858] sm:$0xff] }
 0x10d   :  { %1149 = vmatpush1.msra.mxu1 %v523_v55  ;;  %1079 = vmatprep.subr.mxu0 %v392_v56  ;;  %v484_v36 = vld [vmem:[#allocation2 + $0xc58] sm:$0xff]  ;;  %v355_v37 = vld [vmem:[#allocation2 + $0x850] sm:$0xff] }
 0x10e   :  { %1150 = vmatprep.subr.mxu1 %v520_v57  ;;  %1080 = vmatpush1.msra.mxu0 %v391_v58  ;;  %v483_v38 = vld [vmem:[#allocation2 + $0xc50] sm:$0xff]  ;;  %v352_v39 = vld [vmem:[#allocation2 + $0x838] sm:$0xff] }
 0x10f   :  { %1151 = vmatpush1.msra.mxu1 %v519_v59  ;;  %1081 = vmatprep.subr.mxu0 %v388_v60  ;;  %v480_v40 = vld [vmem:[#allocation2 + $0xc38] sm:$0xff]  ;;  %v351_v41 = vld [vmem:[#allocation2 + $0x830] sm:$0xff] }
 0x110   :  { %1152 = vmatprep.subr.mxu1 %v516_v61  ;;  %1082 = vmatpush1.msra.mxu0 %v387_v63  ;;  %v479_v42 = vld [vmem:[#allocation2 + $0xc30] sm:$0xff]  ;;  %v348_v43 = vld [vmem:[#allocation2 + $0x818] sm:$0xff] }
 0x111   :  { %1153 = vmatpush1.msra.mxu1 %v515_v0  ;;  %1083 = vmatprep.subr.mxu0 %v384_v2  ;;  %v476_v44 = vld [vmem:[#allocation2 + $0xc18] sm:$0xff]  ;;  %v347_v45 = vld [vmem:[#allocation2 + $0x810] sm:$0xff] }
 0x112   :  { %1154 = vmatprep.subr.mxu1 %v512_v3  ;;  %1084 = vmatpush1.msra.mxu0 %v383_v4  ;;  %v475_v46 = vld [vmem:[#allocation2 + $0xc10] sm:$0xff]  ;;  %v472_v47 = vld [vmem:[#allocation2 + $0xbf8] sm:$0xff] }
 0x113   :  { %1155 = vmatpush1.msra.mxu1 %v511_v5  ;;  %1085 = vmatprep.subr.mxu0 %v380_v6  ;;  %v600_v48 = vld [vmem:[#allocation2 + $0xff8] sm:$0xff]  ;;  %v471_v49 = vld [vmem:[#allocation2 + $0xbf0] sm:$0xff] }
 0x114   :  { %1156 = vmatprep.subr.mxu1 %v508_v7  ;;  %1086 = vmatpush1.msra.mxu0 %v379_v9  ;;  %v599_v50 = vld [vmem:[#allocation2 + $0xff0] sm:$0xff]  ;;  %v468_v8 = vld [vmem:[#allocation2 + $0xbd8] sm:$0xff] }
 0x115   :  { %1157 = vmatpush1.msra.mxu1 %v507_v11  ;;  %1087 = vmatprep.subr.mxu0 %v376_v12  ;;  %v596_v51 = vld [vmem:[#allocation2 + $0xfd8] sm:$0xff]  ;;  %v467_v53 = vld [vmem:[#allocation2 + $0xbd0] sm:$0xff] }
 0x116   :  { %1158 = vmatprep.subr.mxu1 %v504_v13  ;;  %1088 = vmatpush1.msra.mxu0 %v375_v15  ;;  %v595_v10 = vld [vmem:[#allocation2 + $0xfd0] sm:$0xff]  ;;  %v464_v54 = vld [vmem:[#allocation2 + $0xbb8] sm:$0xff] }
 0x117   :  { %1159 = vmatpush1.msra.mxu1 %v503_v16  ;;  %1089 = vmatprep.subr.mxu0 %v372_v17  ;;  %v592_v62 = vld [vmem:[#allocation2 + $0xfb8] sm:$0xff]  ;;  %v463_v1 = vld [vmem:[#allocation2 + $0xbb0] sm:$0xff] }
 0x118   :  { %1160 = vmatprep.subr.mxu1 %v500_v18  ;;  %1090 = vmatpush1.msra.mxu0 %v371_v20  ;;  %v591_v55 = vld [vmem:[#allocation2 + $0xfb0] sm:$0xff]  ;;  %v460_v56 = vld [vmem:[#allocation2 + $0xb98] sm:$0xff] }
 0x119   :  { %1161 = vmatpush1.msra.mxu1 %v499_v21  ;;  %1091 = vmatprep.subr.mxu0 %v368_v22  ;;  %v588_v57 = vld [vmem:[#allocation2 + $0xf98] sm:$0xff]  ;;  %v459_v58 = vld [vmem:[#allocation2 + $0xb90] sm:$0xff] }
 0x11a   :  { %1162 = vmatprep.subr.mxu1 %v496_v23  ;;  %1092 = vmatpush1.msra.mxu0 %v367_v25  ;;  %v587_v59 = vld [vmem:[#allocation2 + $0xf90] sm:$0xff]  ;;  %v456_v60 = vld [vmem:[#allocation2 + $0xb78] sm:$0xff] }
 0x11b   :  { %1163 = vmatpush1.msra.mxu1 %v495_v26  ;;  %1093 = vmatprep.subr.mxu0 %v364_v27  ;;  %v584_v61 = vld [vmem:[#allocation2 + $0xf78] sm:$0xff]  ;;  %v455_v63 = vld [vmem:[#allocation2 + $0xb70] sm:$0xff] }
 0x11c   :  { %1164 = vmatprep.subr.mxu1 %v492_v28  ;;  %1094 = vmatpush1.msra.mxu0 %v363_v29  ;;  %v583_v0 = vld [vmem:[#allocation2 + $0xf70] sm:$0xff]  ;;  %v452_v2 = vld [vmem:[#allocation2 + $0xb58] sm:$0xff] }
 0x11d   :  { %1165 = vmatpush1.msra.mxu1 %v491_v30  ;;  %1095 = vmatprep.subr.mxu0 %v360_v31  ;;  %v580_v3 = vld [vmem:[#allocation2 + $0xf58] sm:$0xff]  ;;  %v451_v4 = vld [vmem:[#allocation2 + $0xb50] sm:$0xff] }
 0x11e   :  { %1166 = vmatprep.subr.mxu1 %v488_v32  ;;  %1096 = vmatpush1.msra.mxu0 %v359_v33  ;;  %v579_v5 = vld [vmem:[#allocation2 + $0xf50] sm:$0xff]  ;;  %v448_v6 = vld [vmem:[#allocation2 + $0xb38] sm:$0xff] }
 0x11f   :  { %1167 = vmatpush1.msra.mxu1 %v487_v34  ;;  %1097 = vmatprep.subr.mxu0 %v356_v35  ;;  %v576_v7 = vld [vmem:[#allocation2 + $0xf38] sm:$0xff]  ;;  %v447_v9 = vld [vmem:[#allocation2 + $0xb30] sm:$0xff] }
 0x120   :  { %1168 = vmatprep.subr.mxu1 %v484_v36  ;;  %1098 = vmatpush1.msra.mxu0 %v355_v37  ;;  %v575_v11 = vld [vmem:[#allocation2 + $0xf30] sm:$0xff]  ;;  %v444_v12 = vld [vmem:[#allocation2 + $0xb18] sm:$0xff] }
 0x121   :  { %1169 = vmatpush1.msra.mxu1 %v483_v38  ;;  %1099 = vmatprep.subr.mxu0 %v352_v39  ;;  %v572_v13 = vld [vmem:[#allocation2 + $0xf18] sm:$0xff]  ;;  %v443_v15 = vld [vmem:[#allocation2 + $0xb10] sm:$0xff] }
 0x122   :  { %1170 = vmatprep.subr.mxu1 %v480_v40  ;;  %1100 = vmatpush1.msra.mxu0 %v351_v41  ;;  %v571_v16 = vld [vmem:[#allocation2 + $0xf10] sm:$0xff]  ;;  %v440_v17 = vld [vmem:[#allocation2 + $0xaf8] sm:$0xff] }
 0x123   :  { %1171 = vmatpush1.msra.mxu1 %v479_v42  ;;  %1101 = vmatprep.subr.mxu0 %v348_v43  ;;  %v568_v18 = vld [vmem:[#allocation2 + $0xef8] sm:$0xff]  ;;  %v439_v20 = vld [vmem:[#allocation2 + $0xaf0] sm:$0xff] }
 0x124   :  { %1172 = vmatprep.subr.mxu1 %v476_v44  ;;  %1102 = vmatpush1.msra.mxu0 %v347_v45  ;;  %v567_v21 = vld [vmem:[#allocation2 + $0xef0] sm:$0xff]  ;;  %v436_v22 = vld [vmem:[#allocation2 + $0xad8] sm:$0xff] }
 0x125   :  { %1173 = vmatpush1.msra.mxu1 %v475_v46  ;;  %1103 = vmatprep.subr.mxu0 %v472_v47  ;;  %v564_v23 = vld [vmem:[#allocation2 + $0xed8] sm:$0xff]  ;;  %v435_v25 = vld [vmem:[#allocation2 + $0xad0] sm:$0xff] }
 0x126   :  { %1174 = vmatprep.subr.mxu1 %v600_v48  ;;  %1104 = vmatpush2.msra.mxu0 %v471_v49  ;;  %v563_v26 = vld [vmem:[#allocation2 + $0xed0] sm:$0xff]  ;;  %v432_v27 = vld [vmem:[#allocation2 + $0xab8] sm:$0xff] }
 0x127   :  { %1175 = vmatpush2.msra.mxu1 %v599_v50  ;;  %1105 = vmatprep.subr.mxu0 %v468_v8  ;;  %v560_v28 = vld [vmem:[#allocation2 + $0xeb8] sm:$0xff]  ;;  %v431_v29 = vld [vmem:[#allocation2 + $0xab0] sm:$0xff] }
 0x128   :  { %1176 = vmatprep.subr.mxu1 %v596_v51  ;;  %1106 = vmatpush2.msra.mxu0 %v467_v53  ;;  %v559_v30 = vld [vmem:[#allocation2 + $0xeb0] sm:$0xff]  ;;  %v428_v31 = vld [vmem:[#allocation2 + $0xa98] sm:$0xff] }
 0x129   :  { %1177 = vmatpush2.msra.mxu1 %v595_v10  ;;  %1107 = vmatprep.subr.mxu0 %v464_v54  ;;  %v556_v32 = vld [vmem:[#allocation2 + $0xe98] sm:$0xff]  ;;  %v427_v33 = vld [vmem:[#allocation2 + $0xa90] sm:$0xff] }
 0x12a   :  { %1178 = vmatprep.subr.mxu1 %v592_v62  ;;  %1108 = vmatpush2.msra.mxu0 %v463_v1  ;;  %v555_v34 = vld [vmem:[#allocation2 + $0xe90] sm:$0xff]  ;;  %v424_v35 = vld [vmem:[#allocation2 + $0xa78] sm:$0xff] }
 0x12b   :  { %1179 = vmatpush2.msra.mxu1 %v591_v55  ;;  %1109 = vmatprep.subr.mxu0 %v460_v56  ;;  %v552_v36 = vld [vmem:[#allocation2 + $0xe78] sm:$0xff]  ;;  %v423_v37 = vld [vmem:[#allocation2 + $0xa70] sm:$0xff]  ;;  %v1254_v55 = vld [vmem:[#allocation4 + $0xe8] sm:$0xff] }
 0x12c   :  { %1180 = vmatprep.subr.mxu1 %v588_v57  ;;  %1110 = vmatpush2.msra.mxu0 %v459_v58  ;;  %v551_v38 = vld [vmem:[#allocation2 + $0xe70] sm:$0xff]  ;;  %v420_v39 = vld [vmem:[#allocation2 + $0xa58] sm:$0xff]  ;;  %v1286_v57 = vld [vmem:[#allocation4 + $0x1e8] sm:$0xff] }
 0x12d   :  { %1181 = vmatpush2.msra.mxu1 %v587_v59  ;;  %1111 = vmatprep.subr.mxu0 %v456_v60  ;;  %v548_v40 = vld [vmem:[#allocation2 + $0xe58] sm:$0xff]  ;;  %v419_v41 = vld [vmem:[#allocation2 + $0xa50] sm:$0xff]  ;;  %v1285_v58 = vld [vmem:[#allocation4 + $0x1e0] sm:$0xff] }
 0x12e   :  { %1182 = vmatprep.subr.mxu1 %v584_v61  ;;  %1112 = vmatpush2.msra.mxu0 %v455_v63  ;;  %v547_v42 = vld [vmem:[#allocation2 + $0xe50] sm:$0xff]  ;;  %v416_v43 = vld [vmem:[#allocation2 + $0xa38] sm:$0xff]  ;;  %v1269_v60 = vld [vmem:[#allocation4 + $0x160] sm:$0xff] }
 0x12f   :  { %1183 = vmatpush2.msra.mxu1 %v583_v0  ;;  %1113 = vmatprep.subr.mxu0 %v452_v2  ;;  %v544_v44 = vld [vmem:[#allocation2 + $0xe38] sm:$0xff]  ;;  %v415_v45 = vld [vmem:[#allocation2 + $0xa30] sm:$0xff] }
 0x130   :  { %1184 = vmatprep.subr.mxu1 %v580_v3  ;;  %1114 = vmatpush2.msra.mxu0 %v451_v4  ;;  %v543_v46 = vld [vmem:[#allocation2 + $0xe30] sm:$0xff]  ;;  %v412_v47 = vld [vmem:[#allocation2 + $0xa18] sm:$0xff] }
 0x131   :  { %1185 = vmatpush2.msra.mxu1 %v579_v5  ;;  %1115 = vmatprep.subr.mxu0 %v448_v6  ;;  %v540_v48 = vld [vmem:[#allocation2 + $0xe18] sm:$0xff]  ;;  %v411_v49 = vld [vmem:[#allocation2 + $0xa10] sm:$0xff]  ;;  %v1250_v5 = vld [vmem:[#allocation4 + $0xc8] sm:$0xff] }
 0x132   :  { %1186 = vmatprep.subr.mxu1 %v576_v7  ;;  %1116 = vmatpush2.msra.mxu0 %v447_v9  ;;  %v539_v50 = vld [vmem:[#allocation2 + $0xe10] sm:$0xff]  ;;  %v1256_v8 = vld [vmem:[#allocation4 + $0xf8] sm:$0xff]  ;;  %v1234_v7 = vld [vmem:[#allocation4 + $0x48] sm:$0xff] }
 0x133   :  { %1187 = vmatpush2.msra.mxu1 %v575_v11  ;;  %1117 = vmatprep.subr.mxu0 %v444_v12  ;;  %v1240_v51 = vld [vmem:[#allocation4 + $0x78] sm:$0xff]  ;;  %v1255_v53 = vld [vmem:[#allocation4 + $0xf0] sm:$0xff]  ;;  %v1282_v9 = vld [vmem:[#allocation4 + $0x1c8] sm:$0xff] }
 0x134   :  { %1188 = vmatprep.subr.mxu1 %v572_v13  ;;  %1118 = vmatpush2.msra.mxu0 %v443_v15  ;;  %v1239_v10 = vld [vmem:[#allocation4 + $0x70] sm:$0xff]  ;;  %v1288_v54 = vld [vmem:[#allocation4 + $0x1f8] sm:$0xff]  ;;  %v1249_v11 = vld [vmem:[#allocation4 + $0xc0] sm:$0xff] }
 0x135   :  { %1189 = vmatpush2.msra.mxu1 %v571_v16  ;;  %1119 = vmatprep.subr.mxu0 %v440_v17  ;;  %v1272_v62 = vld [vmem:[#allocation4 + $0x178] sm:$0xff]  ;;  %v1287_v1 = vld [vmem:[#allocation4 + $0x1f0] sm:$0xff]  ;;  %v1266_v12 = vld [vmem:[#allocation4 + $0x148] sm:$0xff] }
 0x136   :  { %1190 = vmatprep.subr.mxu1 %v568_v18  ;;  %1120 = vmatpush2.msra.mxu0 %v439_v20  ;;  %v1271_v56 = vld [vmem:[#allocation4 + $0x170] sm:$0xff]  ;;  %v1252_v59 = vld [vmem:[#allocation4 + $0xd8] sm:$0xff]  ;;  %v1233_v13 = vld [vmem:[#allocation4 + $0x40] sm:$0xff] }
 0x137   :  { %1191 = vmatpush2.msra.mxu1 %v567_v21  ;;  %1121 = vmatprep.subr.mxu0 %v436_v22  ;;  %v1236_v61 = vld [vmem:[#allocation4 + $0x58] sm:$0xff]  ;;  %v1251_v0 = vld [vmem:[#allocation4 + $0xd0] sm:$0xff]  ;;  %v1281_v15 = vld [vmem:[#allocation4 + $0x1c0] sm:$0xff] }
 0x138   :  { %1192 = vmatprep.subr.mxu1 %v564_v23  ;;  %1122 = vmatpush2.msra.mxu0 %v435_v25  ;;  %v1284_v63 = vld [vmem:[#allocation4 + $0x1d8] sm:$0xff]  ;;  %v1235_v3 = vld [vmem:[#allocation4 + $0x50] sm:$0xff]  ;;  %v1265_v17 = vld [vmem:[#allocation4 + $0x140] sm:$0xff] }
 0x139   :  { %1193 = vmatpush2.msra.mxu1 %v563_v26  ;;  %1123 = vmatprep.subr.mxu0 %v432_v27  ;;  %v1268_v2 = vld [vmem:[#allocation4 + $0x158] sm:$0xff]  ;;  %v1283_v4 = vld [vmem:[#allocation4 + $0x1d0] sm:$0xff]  ;;  %v1246_v26 = vld [vmem:[#allocation4 + $0xa8] sm:$0xff] }
 0x13a   :  { %1194 = vmatprep.subr.mxu1 %v560_v28  ;;  %1124 = vmatpush2.msra.mxu0 %v431_v29  ;;  %v1267_v6 = vld [vmem:[#allocation4 + $0x150] sm:$0xff]  ;;  %v1248_v16 = vld [vmem:[#allocation4 + $0xb8] sm:$0xff]  ;;  %v1230_v28 = vld [vmem:[#allocation4 + $0x28] sm:$0xff] }
 0x13b   :  { %1195 = vmatpush2.msra.mxu1 %v559_v30  ;;  %1125 = vmatprep.subr.mxu0 %v428_v31  ;;  %v1232_v18 = vld [vmem:[#allocation4 + $0x38] sm:$0xff]  ;;  %v1247_v21 = vld [vmem:[#allocation4 + $0xb0] sm:$0xff]  ;;  %v1278_v29 = vld [vmem:[#allocation4 + $0x1a8] sm:$0xff] }
 0x13c   :  { %1196 = vmatprep.subr.mxu1 %v556_v32  ;;  %1126 = vmatpush2.msra.mxu0 %v427_v33  ;;  %v1280_v20 = vld [vmem:[#allocation4 + $0x1b8] sm:$0xff]  ;;  %v1231_v23 = vld [vmem:[#allocation4 + $0x30] sm:$0xff]  ;;  %v1245_v30 = vld [vmem:[#allocation4 + $0xa0] sm:$0xff] }
 0x13d   :  { %1197 = vmatpush2.msra.mxu1 %v555_v34  ;;  %1127 = vmatprep.subr.mxu0 %v424_v35  ;;  %v1264_v22 = vld [vmem:[#allocation4 + $0x138] sm:$0xff]  ;;  %v1279_v25 = vld [vmem:[#allocation4 + $0x1b0] sm:$0xff]  ;;  %v1229_v31 = vld [vmem:[#allocation4 + $0x20] sm:$0xff] }
 0x13e   :  { %1198 = vmatprep.subr.mxu1 %v552_v36  ;;  %1128 = vmatpush2.msra.mxu0 %v423_v37  ;;  %v1263_v27 = vld [vmem:[#allocation4 + $0x130] sm:$0xff]  ;;  %v1244_v32 = vld [vmem:[#allocation4 + $0x98] sm:$0xff]  ;;  %v1242_v36 = vld [vmem:[#allocation4 + $0x88] sm:$0xff] }
 0x13f   :  { %1199 = vmatpush2.msra.mxu1 %v551_v38  ;;  %1129 = vmatprep.subr.mxu0 %v420_v39  ;;  %v1228_v33 = vld [vmem:[#allocation4 + $0x18] sm:$0xff]  ;;  %v1243_v34 = vld [vmem:[#allocation4 + $0x90] sm:$0xff]  ;;  %v1226_v37 = vld [vmem:[#allocation4 + $0x8] sm:$0xff] }
 0x140   :  { %1200 = vmatprep.subr.mxu1 %v548_v40  ;;  %1130 = vmatpush2.msra.mxu0 %v419_v41  ;;  %v1227_v35 = vld [vmem:[#allocation4 + $0x10] sm:$0xff]  ;;  %v1241_v38 = vld [vmem:[#allocation4 + $0x80] sm:$0xff]  ;;  %v711_v40 = vpop.f32.mrf.mxu0 }
 0x141   :  { %1201 = vmatpush2.msra.mxu1 %v547_v42  ;;  %1131 = vmatprep.subr.mxu0 %v416_v43  ;;  %v1225_v39 = vld [vmem:[#allocation4] sm:$0xff]  ;;  %v782_v41 = vpop.f32.mrf.mxu1 }
 0x142   :  { %1202 = vmatprep.subr.mxu1 %v544_v44  ;;  %1132 = vmatpush2.msra.mxu0 %v415_v45  ;;  %v713_v42 = vpop.f32.mrf.mxu0  ;;  %v783_v44 = vadd.f32 %v782_v41, %v711_v40 }
 0x143   :  { %1203 = vmatpush2.msra.mxu1 %v543_v46  ;;  %1133 = vmatprep.subr.mxu0 %v412_v47  ;;  %v784_v43 = vpop.f32.mrf.mxu1 }
 0x144   :  { %1204 = vmatprep.subr.mxu1 %v540_v48  ;;  %1134 = vmatpush2.msra.mxu0 %v411_v49  ;;  %v785_v46 = vadd.f32 %v784_v43, %v713_v42  ;;  %v1542_v43 = vld [vmem:[#allocation6] ss:$0 sm:$0xff] }
 0x145   :  { %1135 = vmatprep.mubr.f32.mxu0 %v1883_v24  ;;  %1205 = vmatpush2.msra.mxu1 %v539_v50  ;;  %v1238_v24 = vld [vmem:[#allocation4 + $0x68] sm:$0xff] }
 0x146   :  { %1206 = vmatprep.mubr.f32.mxu1 %v1887_v52  ;;  %1136 = vmatmul.mubr.f32.vlgmr.msra.gmra.mxu0 %v1876_v14  ;;  %v1253_v52 = vld [vmem:[#allocation4 + $0xe0] sm:$0xff]  ;;  %v1270_v14 = vld [vmem:[#allocation4 + $0x168] sm:$0xff] }
 0x147   :  { %1207 = vmatmul.mubr.f32.vlgmr.msra.gmra.mxu1 %v1879_v19  ;;  %1545 = vmatprep.subr.mxu0 %v1256_v8  ;;  %v1237_v19 = vld [vmem:[#allocation4 + $0x60] sm:$0xff] }
 0x148   :  { %1546 = vmatpush3.msra.mxu0 %v1240_v51  ;;  %1580 = vmatprep.subr.mxu1 %v1288_v54  ;;  %v1277_v54 = vld [vmem:[#allocation4 + $0x1a0] sm:$0xff] }
 0x149   :  { %1547 = vmatprep.subr.mxu0 %v1255_v53  ;;  %1581 = vmatpush3.msra.mxu1 %v1272_v62  ;;  %v1262_v53 = vld [vmem:[#allocation4 + $0x128] sm:$0xff] }
 0x14a   :  { %1548 = vmatpush3.msra.mxu0 %v1239_v10  ;;  %1582 = vmatprep.subr.mxu1 %v1287_v1  ;;  %v1261_v1 = vld [vmem:[#allocation4 + $0x120] sm:$0xff] }
 0x14b   :  { %1549 = vmatprep.subr.mxu0 %v1254_v55  ;;  %1583 = vmatpush3.msra.mxu1 %v1271_v56  ;;  %v1276_v56 = vld [vmem:[#allocation4 + $0x198] sm:$0xff] }
 0x14c   :  { %1550 = vmatpush3.msra.mxu0 %v1238_v24  ;;  %1584 = vmatprep.subr.mxu1 %v1286_v57  ;;  %v1260_v24 = vld [vmem:[#allocation4 + $0x118] sm:$0xff] }
 0x14d   :  { %1551 = vmatprep.subr.mxu0 %v1253_v52  ;;  %1585 = vmatpush3.msra.mxu1 %v1270_v14  ;;  %v1275_v52 = vld [vmem:[#allocation4 + $0x190] sm:$0xff] }
 0x14e   :  { %1552 = vmatpush3.msra.mxu0 %v1237_v19  ;;  %1586 = vmatprep.subr.mxu1 %v1285_v58  ;;  %v1259_v19 = vld [vmem:[#allocation4 + $0x110] sm:$0xff]  ;;  %v1274_v58 = vld [vmem:[#allocation4 + $0x188] sm:$0xff] }
 0x14f   :  { %1553 = vmatprep.subr.mxu0 %v1252_v59  ;;  %1587 = vmatpush3.msra.mxu1 %v1269_v60  ;;  %v1258_v59 = vld [vmem:[#allocation4 + $0x108] sm:$0xff]  ;;  %v1273_v60 = vld [vmem:[#allocation4 + $0x180] sm:$0xff] }
 0x150   :  { %1554 = vmatpush3.msra.mxu0 %v1236_v61  ;;  %1588 = vmatprep.subr.mxu1 %v1284_v63  ;;  %v1257_v61 = vld [vmem:[#allocation4 + $0x100] sm:$0xff] }
 0x151   :  { %1555 = vmatprep.subr.mxu0 %v1251_v0  ;;  %1589 = vmatpush3.msra.mxu1 %v1268_v2  ;;  %v1454_v63 = vld [vmem:[#allocation7 + $0x78] sm:$0xff]  ;;  %v1797_v0 = vmov 0.0   ;;  %v1453_v2 = vld [vmem:[#allocation7 + $0x70] sm:$0xff] }
 0x152   :  { %1556 = vmatpush3.msra.mxu0 %v1235_v3  ;;  %1590 = vmatprep.subr.mxu1 %v1283_v4  ;;  %v1452_v3 = vld [vmem:[#allocation7 + $0x68] sm:$0xff]  ;;  %v1451_v4 = vld [vmem:[#allocation7 + $0x60] sm:$0xff] }
 0x153   :  { %1557 = vmatprep.subr.mxu0 %v1250_v5  ;;  %1591 = vmatpush3.msra.mxu1 %v1267_v6  ;;  %v1450_v5 = vld [vmem:[#allocation7 + $0x58] sm:$0xff]  ;;  %v1449_v6 = vld [vmem:[#allocation7 + $0x50] sm:$0xff] }
 0x154   :  { %1558 = vmatpush3.msra.mxu0 %v1234_v7  ;;  %1592 = vmatprep.subr.mxu1 %v1282_v9  ;;  %v1448_v7 = vld [vmem:[#allocation7 + $0x48] sm:$0xff]  ;;  %v1447_v9 = vld [vmem:[#allocation7 + $0x40] sm:$0xff] }
 0x155   :  { %1559 = vmatprep.subr.mxu0 %v1249_v11  ;;  %1593 = vmatpush3.msra.mxu1 %v1266_v12  ;;  %v1446_v11 = vld [vmem:[#allocation7 + $0x38] sm:$0xff]  ;;  %v1445_v12 = vld [vmem:[#allocation7 + $0x30] sm:$0xff] }
 0x156   :  { %1560 = vmatpush3.msra.mxu0 %v1233_v13  ;;  %1594 = vmatprep.subr.mxu1 %v1281_v15  ;;  %v1444_v13 = vld [vmem:[#allocation7 + $0x28] sm:$0xff] }
 0x157   :  { %1561 = vmatprep.subr.mxu0 %v1248_v16  ;;  %1595 = vmatpush3.msra.mxu1 %v1265_v17 }
 0x158   :  { %1562 = vmatpush3.msra.mxu0 %v1232_v18  ;;  %1596 = vmatprep.subr.mxu1 %v1280_v20 }
 0x159   :  { %1563 = vmatprep.subr.mxu0 %v1247_v21  ;;  %1597 = vmatpush3.msra.mxu1 %v1264_v22 }
 0x15a   :  { %1564 = vmatpush3.msra.mxu0 %v1231_v23  ;;  %1598 = vmatprep.subr.mxu1 %v1279_v25 }
 0x15b   :  { %1565 = vmatprep.subr.mxu0 %v1246_v26  ;;  %1599 = vmatpush3.msra.mxu1 %v1263_v27 }
 0x15c   :  { %1566 = vmatpush3.msra.mxu0 %v1230_v28  ;;  %1600 = vmatprep.subr.mxu1 %v1278_v29 }
 0x15d   :  { %1567 = vmatprep.subr.mxu0 %v1245_v30  ;;  %1601 = vmatpush3.msra.mxu1 %v1262_v53 }
 0x15e   :  { %1568 = vmatpush3.msra.mxu0 %v1229_v31  ;;  %1602 = vmatprep.subr.mxu1 %v1277_v54 }
 0x15f   :  { %1569 = vmatprep.subr.mxu0 %v1244_v32  ;;  %1603 = vmatpush3.msra.mxu1 %v1261_v1 }
 0x160   :  { %1570 = vmatpush3.msra.mxu0 %v1228_v33  ;;  %1604 = vmatprep.subr.mxu1 %v1276_v56 }
 0x161   :  { %1571 = vmatprep.subr.mxu0 %v1243_v34  ;;  %1605 = vmatpush3.msra.mxu1 %v1260_v24 }
 0x162   :  { %1572 = vmatpush3.msra.mxu0 %v1227_v35  ;;  %1606 = vmatprep.subr.mxu1 %v1275_v52  ;;  %v1443_v35 = vld [vmem:[#allocation7 + $0x20] sm:$0xff] }
 0x163   :  { %1573 = vmatprep.subr.mxu0 %v1242_v36  ;;  %1607 = vmatpush3.msra.mxu1 %v1259_v19  ;;  %v1442_v36 = vld [vmem:[#allocation7 + $0x18] sm:$0xff] }
 0x164   :  { %1574 = vmatpush3.msra.mxu0 %v1226_v37  ;;  %1608 = vmatprep.subr.mxu1 %v1274_v58  ;;  %v1441_v37 = vld [vmem:[#allocation7 + $0x10] sm:$0xff] }
 0x165   :  { %1575 = vmatprep.subr.mxu0 %v1241_v38  ;;  %1609 = vmatpush3.msra.mxu1 %v1258_v59  ;;  %v1440_v38 = vld [vmem:[#allocation7 + $0x8] sm:$0xff] }
 0x166   :  { %1576 = vmatpush3.msra.mxu0 %v1225_v39  ;;  %1610 = vmatprep.subr.mxu1 %v1273_v60  ;;  %v1439_v39 = vld [vmem:[#allocation7] sm:$0xff] }
 0x167   :  { %1611 = vmatpush3.msra.mxu1 %v1257_v61  ;;  %1632 = vmatprep.subr.mxu0 %v1797_v0 }
 0x182   :  { %v853_v45 = vpop.f32.mrf.mxu0 }
 0x183   :  { %v854_v47 = vadd.f32 %v853_v45, %v783_v44 }
 0x184   :  { %v924_v48 = vpop.f32.mrf.mxu1  ;;  %v855_v49 = vpop.f32.mrf.mxu0 }
 0x185   :  { %v925_v50 = vadd.f32 %v924_v48, %v854_v47  ;;  %v856_v8 = vadd.f32 %v855_v49, %v785_v46 }
 0x186   :  { %v926_v51 = vpop.f32.mrf.mxu1 }
 0x187   :  { %v927_v10 = vadd.f32 %v926_v51, %v856_v8  ;;  %v1217_v62 = vmul.f32 0.01, %v925_v50  ;;  %vm1213_vm0 = vcmp.ge.f32.partialorder %v925_v50, 0.0  ;;  %v1543_v8 = vld [vmem:[#allocation9] ss:$0 sm:$0xff] }
 0x189   :  { %v1218_v55 = vmul.f32 0.01, %v927_v10  ;;  %vm1214_vm1 = vcmp.ge.f32.partialorder %v927_v10, 0.0  ;;  %v1221_v14 = vsel %vm1213_vm0, %v925_v50, %v1217_v62 }
 0x18b   :  { %v1222_v57 = vsel %vm1214_vm1, %v927_v10, %v1218_v55 }
 0x18c   :  { %1360 = vmatprep.mubr.f32.mxu0 %v1222_v57 }
 0x18d   :  { %1361 = vmatmul.mubr.f32.vlgmr.msra.gmra.mxu0 %v1221_v14 }
 0x18e   :  { %1633 = vmatpush3.msra.mxu0 %v1454_v63  ;;  %1664 = vmatprep.mubr.msk.f32.mxu0 %vm1798_vm4, %v1797_v0 }
 0x18f   :  { %1634 = vmatprep.subr.mxu0 %v1797_v0 }
 0x190   :  { %1635 = vmatpush3.msra.mxu0 %v1453_v2 }
 0x191   :  { %1636 = vmatprep.subr.mxu0 %v1797_v0 }
 0x192   :  { %1637 = vmatpush3.msra.mxu0 %v1452_v3 }
 0x193   :  { %1638 = vmatprep.subr.mxu0 %v1797_v0 }
 0x194   :  { %1639 = vmatpush3.msra.mxu0 %v1451_v4 }
 0x195   :  { %1640 = vmatprep.subr.mxu0 %v1797_v0 }
 0x196   :  { %1641 = vmatpush3.msra.mxu0 %v1450_v5 }
 0x197   :  { %1642 = vmatprep.subr.mxu0 %v1797_v0 }
 0x198   :  { %1643 = vmatpush3.msra.mxu0 %v1449_v6 }
 0x199   :  { %1644 = vmatprep.subr.mxu0 %v1797_v0 }
 0x19a   :  { %1645 = vmatpush3.msra.mxu0 %v1448_v7 }
 0x19b   :  { %1646 = vmatprep.subr.mxu0 %v1797_v0 }
 0x19c   :  { %1647 = vmatpush3.msra.mxu0 %v1447_v9 }
 0x19d   :  { %1648 = vmatprep.subr.mxu0 %v1797_v0 }
 0x19e   :  { %1649 = vmatpush3.msra.mxu0 %v1446_v11 }
 0x19f   :  { %1650 = vmatprep.subr.mxu0 %v1797_v0 }
 0x1a0   :  { %1651 = vmatpush3.msra.mxu0 %v1445_v12 }
 0x1a1   :  { %1652 = vmatprep.subr.mxu0 %v1797_v0 }
 0x1a2   :  { %1653 = vmatpush3.msra.mxu0 %v1444_v13 }
 0x1a3   :  { %1654 = vmatprep.subr.mxu0 %v1797_v0 }
 0x1a4   :  { %1655 = vmatpush3.msra.mxu0 %v1443_v35 }
 0x1a5   :  { %1656 = vmatprep.subr.mxu0 %v1797_v0 }
 0x1a6   :  { %1657 = vmatpush3.msra.mxu0 %v1442_v36 }
 0x1a7   :  { %1658 = vmatprep.subr.mxu0 %v1797_v0 }
 0x1a8   :  { %1659 = vmatpush3.msra.mxu0 %v1441_v37 }
 0x1a9   :  { %1660 = vmatprep.subr.mxu0 %v1797_v0 }
 0x1aa   :  { %1661 = vmatpush3.msra.mxu0 %v1440_v38 }
 0x1ab   :  { %1662 = vmatprep.subr.mxu0 %v1797_v0 }
 0x1ac   :  { %1663 = vmatpush3.msra.mxu0 %v1439_v39 }
 0x1c4   :  { %v995_v15 = vpop.f32.mrf.mxu0 }
 0x1c5   :  { %v1066_v16 = vpop.f32.mrf.mxu1 }
 0x1c6   :  { %v997_v17 = vpop.f32.mrf.mxu0  ;;  %v1067_v20 = vadd.f32 %v1066_v16, %v995_v15 }
 0x1c7   :  { %v1068_v18 = vpop.f32.mrf.mxu1 }
 0x1c8   :  { %v1069_v23 = vadd.f32 %v1068_v18, %v997_v17 }
 0x206   :  { %v1137_v21 = vpop.f32.mrf.mxu0 }
 0x207   :  { %v1208_v22 = vpop.f32.mrf.mxu1  ;;  %v1138_v25 = vadd.f32 %v1137_v21, %v1067_v20 }
 0x208   :  { %v1139_v26 = vpop.f32.mrf.mxu0 }
 0x209   :  { %v1209_v27 = vadd.f32 %v1208_v22, %v1138_v25  ;;  %v1140_v28 = vadd.f32 %v1139_v26, %v1069_v23  ;;  %v1210_v29 = vpop.f32.mrf.mxu1 }
 0x20b   :  { %v1211_v30 = vadd.f32 %v1210_v29, %v1140_v28  ;;  %v1219_v31 = vmul.f32 0.01, %v1209_v27  ;;  %vm1215_vm2 = vcmp.ge.f32.partialorder %v1209_v27, 0.0 }
 0x20d   :  { %v1220_v32 = vmul.f32 0.01, %v1211_v30  ;;  %vm1216_vm3 = vcmp.ge.f32.partialorder %v1211_v30, 0.0  ;;  %v1223_v34 = vsel %vm1215_vm2, %v1209_v27, %v1219_v31 }
 0x20f   :  { %v1224_v33 = vsel %vm1216_vm3, %v1211_v30, %v1220_v32 }
 0x210   :  { %1430 = vmatprep.mubr.f32.mxu1 %v1224_v33 }
 0x211   :  { %1431 = vmatmul.mubr.f32.vlgmr.msra.gmra.mxu1 %v1223_v34 }
 0x24d   :  { %v1577_v40 = vpop.f32.mrf.mxu0 }
 0x24f   :  { %v1578_v41 = vpop.f32.mrf.mxu0 }
 0x250   :  { %v1579_v42 = vadd.f32 %v1578_v41, %v1577_v40 }
 0x252   :  { %v1363_v46 = vadd.f32 %v1579_v42, %v1542_v43 }
 0x2d1   :  { %v1612_v44 = vpop.f32.mrf.mxu1 }
 0x2d3   :  { %v1613_v45 = vpop.f32.mrf.mxu1 }
 0x2d4   :  { %v1614_v47 = vadd.f32 %v1613_v45, %v1612_v44 }
 0x2d6   :  { %v1433_v48 = vadd.f32 %v1614_v47, %v1363_v46 }
 0x2d8   :  { %v1437_v49 = vmul.f32 0.01, %v1433_v48  ;;  %vm1436_vm5 = vcmp.ge.f32.partialorder %v1433_v48, 0.0 }
 0x2da   :  { %v1438_v50 = vsel %vm1436_vm5, %v1433_v48, %v1437_v49 }
 0x2db   :  { %1665 = vmatmul.mubr.f32.vlgmr.msra.gmra.mxu0 %v1438_v50 }
 0x39b   :  { %v1528_v51 = vpop.f32.mrf.mxu0 }
 0x39c   :  { %v1529_v53 = vadd.f32 %v1543_v8, %v1528_v51 }
 0x39d   :  { %v1666_v10 = vpop.f32.mrf.mxu0 }
 0x39e   :  { %v1544_v54 = vclamps-f32 %v1529_v53, 15.0 }
 0x3a0   :  { %1534 = vst [vmem:[%s1927_s6] sm:$0x3] %v1544_v54 }
 0x3a1   :  { %1539 = vsyncpa [#allocation3], 1 }
 0x3a2   :  { %1540 = vsyncpa [#allocation5], 1 }
 0x3a3   :  { %1541 = vsyncpa [#allocation8], 1 }

</bundles_post_ra>
